<compile_context>
chip_gen: v7x
topology: tpu7x:2x2x1
jax: 0.10.0
libtpu: 0.0.40
codegen_flags: <defaults>
</compile_context>

<pallas_src>
import math
import jax
import jax.numpy as jnp
from jax.experimental import pallas as pl
from jax.experimental.pallas import tpu as pltpu

# ----------------------------- configuration -----------------------------
B = 2
IN_CH = 4
IMG = (16, 16)
PATCH = (8, 8)
HIDDEN = 32
MLP_DIM = 64
NUM_LAYERS = 2
NUM_HEADS = 4
HEAD_DIM = HIDDEN // NUM_HEADS
NUM_CLASSES = 2
GRID_H = IMG[0] // PATCH[0]
GRID_W = IMG[1] // PATCH[1]
N_PATCH = GRID_H * GRID_W           # 4 patches
SEQ = N_PATCH + 1                    # + cls token
K_PATCH = IN_CH * PATCH[0] * PATCH[1]
LN_EPS = 1e-5
HEAD_PAD = 128                       # lane-dense classifier output width

# embvec slab rows: 0=patch-embed bias, 1=final-LN weight, 2=final-LN bias,
#                   3=cls token, 4..4+N_PATCH=positional embedding
# vecs slab rows (per layer): 0=ln1w, 1=ln1b, 2=attn-out bias,
#                             3=ln2w, 4=ln2b, 5=mlp-out bias, 6-7 unused


# ----------------------------- in-kernel math -----------------------------
def _layer_norm(x, w, b):
    mean = jnp.mean(x, axis=-1, keepdims=True)
    var = jnp.mean(jnp.square(x - mean), axis=-1, keepdims=True)
    return (x - mean) * jax.lax.rsqrt(var + LN_EPS) * w + b


def _erf(x):
    # Abramowitz & Stegun 7.1.26 polynomial (|err| < 1.5e-7, f32-accurate);
    # keeps exact (erf-based) torch.nn.GELU semantics without relying on a
    # lax.erf lowering inside Mosaic.
    a1, a2, a3, a4, a5 = 0.254829592, -0.284496736, 1.421413741, -1.453152027, 1.061405429
    p = 0.3275911
    sgn = jnp.where(x >= 0.0, 1.0, -1.0)
    z = jnp.abs(x)
    t = 1.0 / (1.0 + p * z)
    poly = ((((a5 * t + a4) * t + a3) * t + a2) * t + a1) * t
    return sgn * (1.0 - poly * jnp.exp(-z * z))


def _gelu(x):
    # exact GELU (torch.nn.GELU default, approximate='none')
    return 0.5 * x * (1.0 + _erf(x * 0.7071067811865476))


def _softmax_last(x):
    x = x - jnp.max(x, axis=-1, keepdims=True)
    e = jnp.exp(x)
    return e * (1.0 / jnp.sum(e, axis=-1, keepdims=True))


# ------------------------------- fused kernel ------------------------------
def vit_kernel(p_ref, wpe_ref, emb_ref, vecs_ref, b1_ref, wqkv_ref, wo_ref,
               w1_ref, w2_ref, head_ref, o_ref, tok_scr, cat_scr):
    # p_ref:   (1, N_PATCH, K_PATCH)      wpe_ref: (K_PATCH, HIDDEN)
    # emb_ref: (8, HIDDEN)                vecs_ref:(L, 8, HIDDEN)
    # b1_ref:  (L, 1, MLP_DIM)            wqkv_ref:(L, 3, HIDDEN, HIDDEN)
    # wo_ref:  (L, HIDDEN, HIDDEN)        w1_ref:  (L, HIDDEN, MLP_DIM)
    # w2_ref:  (L, MLP_DIM, HIDDEN)       head_ref:(HIDDEN+8, HEAD_PAD)
    # o_ref:   (1, 1, HEAD_PAD)
    evec = emb_ref[...]

    # ---- patch embedding (Conv2d kernel=stride=patch as matmul) + bias + pos
    emb = jnp.dot(p_ref[0], wpe_ref[...], preferred_element_type=jnp.float32)
    tok_scr[0:1, :] = evec[3:4, :]                                  # cls token
    tok_scr[1:SEQ, :] = emb + evec[0:1, :] + evec[4:4 + N_PATCH, :]
    x = tok_scr[...]                                                # [SEQ, HIDDEN]

    scale = 1.0 / math.sqrt(HEAD_DIM)
    for l in range(NUM_LAYERS):
        vl = vecs_ref[l]                                            # [8, HIDDEN]
        # ---- pre-norm multi-head self attention (no qkv bias), fused QKV
        xn = _layer_norm(x, vl[0:1, :], vl[1:2, :])
        q = jnp.dot(xn, wqkv_ref[l, 0], preferred_element_type=jnp.float32) * scale
        k = jnp.dot(xn, wqkv_ref[l, 1], preferred_element_type=jnp.float32)
        v = jnp.dot(xn, wqkv_ref[l, 2], preferred_element_type=jnp.float32)
        for h in range(NUM_HEADS):
            lo = h * HEAD_DIM
            qh = q[:, lo:lo + HEAD_DIM]
            kh = k[:, lo:lo + HEAD_DIM]
            vh = v[:, lo:lo + HEAD_DIM]
            s = jax.lax.dot_general(qh, kh, (((1,), (1,)), ((), ())),
                                    preferred_element_type=jnp.float32)
            p = _softmax_last(s)
            cat_scr[:, lo:lo + HEAD_DIM] = jnp.dot(
                p, vh, preferred_element_type=jnp.float32)
        # single full-width out-projection on concatenated head outputs
        attn = jnp.dot(cat_scr[...], wo_ref[l],
                       preferred_element_type=jnp.float32) + vl[2:3, :]
        x = x + attn
        # ---- pre-norm MLP (Linear -> GELU -> Linear); dropout_rate = 0.0
        xn2 = _layer_norm(x, vl[3:4, :], vl[4:5, :])
        hmid = _gelu(jnp.dot(xn2, w1_ref[l],
                             preferred_element_type=jnp.float32) + b1_ref[l])
        x = x + jnp.dot(hmid, w2_ref[l],
                        preferred_element_type=jnp.float32) + vl[5:6, :]

    # ---- final LayerNorm + classification head on cls token (lane-padded)
    head = head_ref[...]
    cls_out = _layer_norm(x[0:1, :], evec[1:2, :], evec[2:3, :])
    o_ref[0] = jnp.dot(cls_out, head[0:HIDDEN, :],
                       preferred_element_type=jnp.float32) + head[HIDDEN:HIDDEN + 1, :]


# ------------------------------ pallas call --------------------------------
def _replicated(arr):
    nd = arr.ndim
    return pl.BlockSpec(arr.shape, lambda b, nd=nd: (0,) * nd)


def vit_forward_call(patches, params):
    names = ["wpe", "embvec", "vecs", "b1", "wqkv", "wo", "w1", "w2", "head"]
    args = [patches] + [params[n] for n in names]
    in_specs = [pl.BlockSpec((1, N_PATCH, K_PATCH), lambda b: (b, 0, 0))]
    in_specs += [_replicated(params[n]) for n in names]
    out = pl.pallas_call(
        vit_kernel,
        out_shape=jax.ShapeDtypeStruct((B, 1, HEAD_PAD), jnp.float32),
        grid=(B,),
        in_specs=in_specs,
        out_specs=pl.BlockSpec((1, 1, HEAD_PAD), lambda b: (b, 0, 0)),
        scratch_shapes=[pltpu.VMEM((SEQ, HIDDEN), jnp.float32),   # token buffer
                        pltpu.VMEM((SEQ, HIDDEN), jnp.float32)],  # head concat
        compiler_params=pltpu.CompilerParams(
            dimension_semantics=("parallel",)),   # B shards across TCs on v7x
    )(*args)
    return out[:, 0, :NUM_CLASSES]                # [B, NUM_CLASSES]


# ------------------------------ forward glue -------------------------------
def unimodal_vit_forward(x, params):
    bsz, c, hh, ww = x.shape
    ph, pw = PATCH
    gh, gw = hh // ph, ww // pw
    # NCHW -> [B, N_patches, C*ph*pw] (feature order (c, ph, pw) == Conv2d weight flatten)
    patches = (x.reshape(bsz, c, gh, ph, gw, pw)
                 .transpose(0, 2, 4, 1, 3, 5)
                 .reshape(bsz, gh * gw, c * ph * pw))
    return vit_forward_call(patches, params)


# --------------------------- parameter creation ----------------------------
def init_params(key):
    # Matches UnimodalViT.initialize: Linear/Conv weights ~ N(0, 0.02), biases 0,
    # LayerNorm weight=1 bias=0, cls_token=0, positional embedding ~ N(0, 0.02).
    ks = iter(jax.random.split(key, 16))
    n = lambda shape: 0.02 * jax.random.normal(next(ks), shape, jnp.float32)
    p = {}
    # patch embedding: Conv2d(IN_CH, HIDDEN, kernel=stride=PATCH) -> matmul weight
    conv_w = n((HIDDEN, IN_CH, PATCH[0], PATCH[1]))      # torch conv layout (O,C,kh,kw)
    p["wpe"] = conv_w.reshape(HIDDEN, K_PATCH).T         # [K_PATCH, HIDDEN]
    # packed embedding-side vectors
    embvec = jnp.zeros((8, HIDDEN), jnp.float32)
    embvec = embvec.at[1, :].set(1.0)                    # final-LN weight = 1
    embvec = embvec.at[4:4 + N_PATCH, :].set(n((N_PATCH, HIDDEN)))   # pos embed
    p["embvec"] = embvec                                 # rows 0(bpe),2(nfb),3(cls)=0
    # packed per-layer LN/bias vectors
    vecs = jnp.zeros((NUM_LAYERS, 8, HIDDEN), jnp.float32)
    vecs = vecs.at[:, 0, :].set(1.0).at[:, 3, :].set(1.0)   # ln1w, ln2w = 1
    p["vecs"] = vecs
    p["b1"] = jnp.zeros((NUM_LAYERS, 1, MLP_DIM), jnp.float32)
    # fused full-width attention / MLP weights (qkv has no bias, MONAI default)
    p["wqkv"] = n((NUM_LAYERS, 3, HIDDEN, HIDDEN))
    p["wo"] = n((NUM_LAYERS, HIDDEN, HIDDEN))
    p["w1"] = n((NUM_LAYERS, HIDDEN, MLP_DIM))
    p["w2"] = n((NUM_LAYERS, MLP_DIM, HIDDEN))
    # classification head, zero-padded to 128 lane-dense output columns
    head = jnp.zeros((HIDDEN + 8, HEAD_PAD), jnp.float32)
    head = head.at[0:HIDDEN, 0:NUM_CLASSES].set(n((HIDDEN, NUM_CLASSES)))
    # row HIDDEN holds the head bias (zeros)
    p["head"] = head
    return p


if __name__ == "__main__":
    root = jax.random.PRNGKey(0)
    kx, kp = jax.random.split(root)
    x = jax.random.normal(kx, (B, IN_CH, IMG[0], IMG[1]), jnp.float32)  # NCHW like torch
    params = init_params(kp)

    logits = jax.jit(unimodal_vit_forward)(x, params)
    logits = jax.block_until_ready(logits)
    assert logits.shape == (B, NUM_CLASSES) and logits.dtype == jnp.float32
    # dropout_rate = 0.0 -> all dropouts are identities (exact).
    print("KERNEL_OK")
</pallas_src>

<mosaic_0001>
module attributes {stable_mosaic.version = 11 : i64} {
  func.func @vit_kernel(%arg0: i32, %arg1: memref<1x4x256xf32, #tpu.memory_space<vmem>>, %arg2: memref<256x32xf32, #tpu.memory_space<vmem>>, %arg3: memref<8x32xf32, #tpu.memory_space<vmem>>, %arg4: memref<2x8x32xf32, #tpu.memory_space<vmem>>, %arg5: memref<2x1x64xf32, #tpu.memory_space<vmem>>, %arg6: memref<2x3x32x32xf32, #tpu.memory_space<vmem>>, %arg7: memref<2x32x32xf32, #tpu.memory_space<vmem>>, %arg8: memref<2x32x64xf32, #tpu.memory_space<vmem>>, %arg9: memref<2x64x32xf32, #tpu.memory_space<vmem>>, %arg10: memref<40x128xf32, #tpu.memory_space<vmem>>, %arg11: memref<1x1x128xf32, #tpu.memory_space<vmem>>, %arg12: memref<5x32xf32, #tpu.memory_space<vmem>>, %arg13: memref<5x32xf32, #tpu.memory_space<vmem>>) attributes {dimension_semantics = [#tpu.dimension_semantics<parallel>], iteration_bounds = array<i64: 2>, scalar_prefetch = 0 : i64, scratch_operands = 2 : i64, tpu.core_type = #tpu.core_type<tc>, window_params = [{transform_indices = @transform_0, window_bounds = array<i64: 1, 4, 256>}, {pipeline_mode = #tpu.pipeline_mode<synchronous>, transform_indices = @transform_1, window_bounds = array<i64: 256, 32>}, {pipeline_mode = #tpu.pipeline_mode<synchronous>, transform_indices = @transform_2, window_bounds = array<i64: 8, 32>}, {pipeline_mode = #tpu.pipeline_mode<synchronous>, transform_indices = @transform_3, window_bounds = array<i64: 2, 8, 32>}, {pipeline_mode = #tpu.pipeline_mode<synchronous>, transform_indices = @transform_4, window_bounds = array<i64: 2, 1, 64>}, {pipeline_mode = #tpu.pipeline_mode<synchronous>, transform_indices = @transform_5, window_bounds = array<i64: 2, 3, 32, 32>}, {pipeline_mode = #tpu.pipeline_mode<synchronous>, transform_indices = @transform_6, window_bounds = array<i64: 2, 32, 32>}, {pipeline_mode = #tpu.pipeline_mode<synchronous>, transform_indices = @transform_7, window_bounds = array<i64: 2, 32, 64>}, {pipeline_mode = #tpu.pipeline_mode<synchronous>, transform_indices = @transform_8, window_bounds = array<i64: 2, 64, 32>}, {pipeline_mode = #tpu.pipeline_mode<synchronous>, transform_indices = @transform_9, window_bounds = array<i64: 40, 128>}, {transform_indices = @transform_10, window_bounds = array<i64: 1, 1, 128>}]} {
    %c0 = arith.constant 0 : index
    %c0_0 = arith.constant 0 : index
    %0 = vector.load %arg3[%c0, %c0_0] : memref<8x32xf32, #tpu.memory_space<vmem>>, vector<8x32xf32>
    %c0_1 = arith.constant 0 : index
    %c0_2 = arith.constant 0 : index
    %c0_3 = arith.constant 0 : index
    %1 = vector.load %arg1[%c0_1, %c0_2, %c0_3] : memref<1x4x256xf32, #tpu.memory_space<vmem>>, vector<1x4x256xf32>
    %2 = vector.shape_cast %1 : vector<1x4x256xf32> to vector<4x256xf32>
    %c0_4 = arith.constant 0 : index
    %c0_5 = arith.constant 0 : index
    %3 = vector.load %arg2[%c0_4, %c0_5] : memref<256x32xf32, #tpu.memory_space<vmem>>, vector<256x32xf32>
    %cst = arith.constant dense<0.000000e+00> : vector<4x32xf32>
    %4 = tpu.matmul %2, %3, %cst {dimension_numbers = #tpu.dot_dimension_numbers<[1], [0], [0], [1], [0, 0, 1, 1], [], []>} : vector<4x256xf32>, vector<256x32xf32>, vector<4x32xf32> -> vector<4x32xf32>
    %5 = vector.extract_strided_slice %0 {offsets = [3, 0], sizes = [1, 32], strides = [1, 1]} : vector<8x32xf32> to vector<1x32xf32>
    %c0_6 = arith.constant 0 : index
    %c0_7 = arith.constant 0 : index
    %6 = vector.load %arg12[%c0_6, %c0_7] : memref<5x32xf32, #tpu.memory_space<vmem>>, vector<1x32xf32>
    tpu.vector_store %arg12[%c0_6, %c0_7], %5 {strides = array<i32>} : memref<5x32xf32, #tpu.memory_space<vmem>>, vector<1x32xf32>,
    %7 = vector.extract_strided_slice %0 {offsets = [0, 0], sizes = [1, 32], strides = [1, 1]} : vector<8x32xf32> to vector<1x32xf32>
    %8 = vector.broadcast %7 : vector<1x32xf32> to vector<4x32xf32>
    %9 = arith.addf %4, %8 : vector<4x32xf32>
    %10 = vector.extract_strided_slice %0 {offsets = [4, 0], sizes = [4, 32], strides = [1, 1]} : vector<8x32xf32> to vector<4x32xf32>
    %11 = arith.addf %9, %10 : vector<4x32xf32>
    %c1 = arith.constant 1 : index
    %c0_8 = arith.constant 0 : index
    %12 = vector.load %arg12[%c1, %c0_8] : memref<5x32xf32, #tpu.memory_space<vmem>>, vector<4x32xf32>
    tpu.vector_store %arg12[%c1, %c0_8], %11 {strides = array<i32>} : memref<5x32xf32, #tpu.memory_space<vmem>>, vector<4x32xf32>,
    %c0_9 = arith.constant 0 : index
    %c0_10 = arith.constant 0 : index
    %13 = vector.load %arg12[%c0_9, %c0_10] : memref<5x32xf32, #tpu.memory_space<vmem>>, vector<5x32xf32>
    %c0_11 = arith.constant 0 : index
    %c0_12 = arith.constant 0 : index
    %c0_13 = arith.constant 0 : index
    %14 = vector.load %arg4[%c0_11, %c0_12, %c0_13] : memref<2x8x32xf32, #tpu.memory_space<vmem>>, vector<1x8x32xf32>
    %15 = vector.shape_cast %14 : vector<1x8x32xf32> to vector<8x32xf32>
    %16 = vector.extract_strided_slice %15 {offsets = [0, 0], sizes = [1, 32], strides = [1, 1]} : vector<8x32xf32> to vector<1x32xf32>
    %17 = vector.extract_strided_slice %15 {offsets = [1, 0], sizes = [1, 32], strides = [1, 1]} : vector<8x32xf32> to vector<1x32xf32>
    %cst_14 = arith.constant dense<0.000000e+00> : vector<5xf32>
    %18 = vector.multi_reduction <add>, %13, %cst_14 [1] : vector<5x32xf32> to vector<5xf32>
    %19 = vector.shape_cast %18 : vector<5xf32> to vector<5x1xf32>
    %cst_15 = arith.constant 3.200000e+01 : f32
    %20 = vector.broadcast %cst_15 : f32 to vector<5x1xf32>
    %21 = arith.divf %19, %20 : vector<5x1xf32>
    %22 = vector.broadcast %21 : vector<5x1xf32> to vector<5x32xf32>
    %23 = arith.subf %13, %22 : vector<5x32xf32>
    %24 = arith.mulf %23, %23 : vector<5x32xf32>
    %cst_16 = arith.constant dense<0.000000e+00> : vector<5xf32>
    %25 = vector.multi_reduction <add>, %24, %cst_16 [1] : vector<5x32xf32> to vector<5xf32>
    %26 = vector.shape_cast %25 : vector<5xf32> to vector<5x1xf32>
    %cst_17 = arith.constant 3.200000e+01 : f32
    %27 = vector.broadcast %cst_17 : f32 to vector<5x1xf32>
    %28 = arith.divf %26, %27 : vector<5x1xf32>
    %29 = vector.broadcast %21 : vector<5x1xf32> to vector<5x32xf32>
    %30 = arith.subf %13, %29 : vector<5x32xf32>
    %cst_18 = arith.constant 9.99999974E-6 : f32
    %31 = vector.broadcast %cst_18 : f32 to vector<5x1xf32>
    %32 = arith.addf %28, %31 : vector<5x1xf32>
    %33 = math.rsqrt %32 : vector<5x1xf32>
    %34 = vector.broadcast %33 : vector<5x1xf32> to vector<5x32xf32>
    %35 = arith.mulf %30, %34 : vector<5x32xf32>
    %36 = vector.broadcast %16 : vector<1x32xf32> to vector<5x32xf32>
    %37 = arith.mulf %35, %36 : vector<5x32xf32>
    %38 = vector.broadcast %17 : vector<1x32xf32> to vector<5x32xf32>
    %39 = arith.addf %37, %38 : vector<5x32xf32>
    %c0_19 = arith.constant 0 : index
    %c0_20 = arith.constant 0 : index
    %c0_21 = arith.constant 0 : index
    %c0_22 = arith.constant 0 : index
    %40 = vector.load %arg6[%c0_19, %c0_20, %c0_21, %c0_22] : memref<2x3x32x32xf32, #tpu.memory_space<vmem>>, vector<1x1x32x32xf32>
    %41 = vector.shape_cast %40 : vector<1x1x32x32xf32> to vector<32x32xf32>
    %cst_23 = arith.constant dense<0.000000e+00> : vector<5x32xf32>
    %42 = tpu.matmul %39, %41, %cst_23 {dimension_numbers = #tpu.dot_dimension_numbers<[1], [0], [0], [1], [0, 0, 1, 1], [], []>} : vector<5x32xf32>, vector<32x32xf32>, vector<5x32xf32> -> vector<5x32xf32>
    %cst_24 = arith.constant 0.353553385 : f32
    %43 = vector.broadcast %cst_24 : f32 to vector<5x32xf32>
    %44 = arith.mulf %42, %43 : vector<5x32xf32>
    %c0_25 = arith.constant 0 : index
    %c1_26 = arith.constant 1 : index
    %c0_27 = arith.constant 0 : index
    %c0_28 = arith.constant 0 : index
    %45 = vector.load %arg6[%c0_25, %c1_26, %c0_27, %c0_28] : memref<2x3x32x32xf32, #tpu.memory_space<vmem>>, vector<1x1x32x32xf32>
    %46 = vector.shape_cast %45 : vector<1x1x32x32xf32> to vector<32x32xf32>
    %cst_29 = arith.constant dense<0.000000e+00> : vector<5x32xf32>
    %47 = tpu.matmul %39, %46, %cst_29 {dimension_numbers = #tpu.dot_dimension_numbers<[1], [0], [0], [1], [0, 0, 1, 1], [], []>} : vector<5x32xf32>, vector<32x32xf32>, vector<5x32xf32> -> vector<5x32xf32>
    %c0_30 = arith.constant 0 : index
    %c2 = arith.constant 2 : index
    %c0_31 = arith.constant 0 : index
    %c0_32 = arith.constant 0 : index
    %48 = vector.load %arg6[%c0_30, %c2, %c0_31, %c0_32] : memref<2x3x32x32xf32, #tpu.memory_space<vmem>>, vector<1x1x32x32xf32>
    %49 = vector.shape_cast %48 : vector<1x1x32x32xf32> to vector<32x32xf32>
    %cst_33 = arith.constant dense<0.000000e+00> : vector<5x32xf32>
    %50 = tpu.matmul %39, %49, %cst_33 {dimension_numbers = #tpu.dot_dimension_numbers<[1], [0], [0], [1], [0, 0, 1, 1], [], []>} : vector<5x32xf32>, vector<32x32xf32>, vector<5x32xf32> -> vector<5x32xf32>
    %51 = vector.extract_strided_slice %44 {offsets = [0, 0], sizes = [5, 8], strides = [1, 1]} : vector<5x32xf32> to vector<5x8xf32>
    %52 = vector.extract_strided_slice %47 {offsets = [0, 0], sizes = [5, 8], strides = [1, 1]} : vector<5x32xf32> to vector<5x8xf32>
    %53 = vector.extract_strided_slice %50 {offsets = [0, 0], sizes = [5, 8], strides = [1, 1]} : vector<5x32xf32> to vector<5x8xf32>
    %cst_34 = arith.constant dense<0.000000e+00> : vector<5x5xf32>
    %54 = tpu.matmul %51, %52, %cst_34 {dimension_numbers = #tpu.dot_dimension_numbers<[1], [1], [0], [0], [0, 0, 1, 0], [], []>} : vector<5x8xf32>, vector<5x8xf32>, vector<5x5xf32> -> vector<5x5xf32>
    %cst_35 = arith.constant dense<0xFF800000> : vector<5xf32>
    %55 = vector.multi_reduction <maximumf>, %54, %cst_35 [1] : vector<5x5xf32> to vector<5xf32>
    %56 = vector.shape_cast %55 : vector<5xf32> to vector<5x1xf32>
    %57 = vector.broadcast %56 : vector<5x1xf32> to vector<5x5xf32>
    %58 = arith.subf %54, %57 : vector<5x5xf32>
    %59 = math.exp %58 : vector<5x5xf32>
    %cst_36 = arith.constant dense<0.000000e+00> : vector<5xf32>
    %60 = vector.multi_reduction <add>, %59, %cst_36 [1] : vector<5x5xf32> to vector<5xf32>
    %61 = vector.shape_cast %60 : vector<5xf32> to vector<5x1xf32>
    %cst_37 = arith.constant 1.000000e+00 : f32
    %62 = vector.broadcast %cst_37 : f32 to vector<5x1xf32>
    %63 = arith.divf %62, %61 : vector<5x1xf32>
    %64 = vector.broadcast %63 : vector<5x1xf32> to vector<5x5xf32>
    %65 = arith.mulf %59, %64 : vector<5x5xf32>
    %cst_38 = arith.constant dense<0.000000e+00> : vector<5x8xf32>
    %66 = tpu.matmul %65, %53, %cst_38 {dimension_numbers = #tpu.dot_dimension_numbers<[1], [0], [0], [1], [0, 0, 1, 1], [], []>} : vector<5x5xf32>, vector<5x8xf32>, vector<5x8xf32> -> vector<5x8xf32>
    %c0_39 = arith.constant 0 : index
    %c0_40 = arith.constant 0 : index
    %67 = vector.load %arg13[%c0_39, %c0_40] : memref<5x32xf32, #tpu.memory_space<vmem>>, vector<5x8xf32>
    tpu.vector_store %arg13[%c0_39, %c0_40], %66 {strides = array<i32>} : memref<5x32xf32, #tpu.memory_space<vmem>>, vector<5x8xf32>,
    %68 = vector.extract_strided_slice %44 {offsets = [0, 8], sizes = [5, 8], strides = [1, 1]} : vector<5x32xf32> to vector<5x8xf32>
    %69 = vector.extract_strided_slice %47 {offsets = [0, 8], sizes = [5, 8], strides = [1, 1]} : vector<5x32xf32> to vector<5x8xf32>
    %70 = vector.extract_strided_slice %50 {offsets = [0, 8], sizes = [5, 8], strides = [1, 1]} : vector<5x32xf32> to vector<5x8xf32>
    %cst_41 = arith.constant dense<0.000000e+00> : vector<5x5xf32>
    %71 = tpu.matmul %68, %69, %cst_41 {dimension_numbers = #tpu.dot_dimension_numbers<[1], [1], [0], [0], [0, 0, 1, 0], [], []>} : vector<5x8xf32>, vector<5x8xf32>, vector<5x5xf32> -> vector<5x5xf32>
    %cst_42 = arith.constant dense<0xFF800000> : vector<5xf32>
    %72 = vector.multi_reduction <maximumf>, %71, %cst_42 [1] : vector<5x5xf32> to vector<5xf32>
    %73 = vector.shape_cast %72 : vector<5xf32> to vector<5x1xf32>
    %74 = vector.broadcast %73 : vector<5x1xf32> to vector<5x5xf32>
    %75 = arith.subf %71, %74 : vector<5x5xf32>
    %76 = math.exp %75 : vector<5x5xf32>
    %cst_43 = arith.constant dense<0.000000e+00> : vector<5xf32>
    %77 = vector.multi_reduction <add>, %76, %cst_43 [1] : vector<5x5xf32> to vector<5xf32>
    %78 = vector.shape_cast %77 : vector<5xf32> to vector<5x1xf32>
    %cst_44 = arith.constant 1.000000e+00 : f32
    %79 = vector.broadcast %cst_44 : f32 to vector<5x1xf32>
    %80 = arith.divf %79, %78 : vector<5x1xf32>
    %81 = vector.broadcast %80 : vector<5x1xf32> to vector<5x5xf32>
    %82 = arith.mulf %76, %81 : vector<5x5xf32>
    %cst_45 = arith.constant dense<0.000000e+00> : vector<5x8xf32>
    %83 = tpu.matmul %82, %70, %cst_45 {dimension_numbers = #tpu.dot_dimension_numbers<[1], [0], [0], [1], [0, 0, 1, 1], [], []>} : vector<5x5xf32>, vector<5x8xf32>, vector<5x8xf32> -> vector<5x8xf32>
    %c0_46 = arith.constant 0 : index
    %c8 = arith.constant 8 : index
    %84 = vector.load %arg13[%c0_46, %c8] : memref<5x32xf32, #tpu.memory_space<vmem>>, vector<5x8xf32>
    tpu.vector_store %arg13[%c0_46, %c8], %83 {strides = array<i32>} : memref<5x32xf32, #tpu.memory_space<vmem>>, vector<5x8xf32>,
    %85 = vector.extract_strided_slice %44 {offsets = [0, 16], sizes = [5, 8], strides = [1, 1]} : vector<5x32xf32> to vector<5x8xf32>
    %86 = vector.extract_strided_slice %47 {offsets = [0, 16], sizes = [5, 8], strides = [1, 1]} : vector<5x32xf32> to vector<5x8xf32>
    %87 = vector.extract_strided_slice %50 {offsets = [0, 16], sizes = [5, 8], strides = [1, 1]} : vector<5x32xf32> to vector<5x8xf32>
    %cst_47 = arith.constant dense<0.000000e+00> : vector<5x5xf32>
    %88 = tpu.matmul %85, %86, %cst_47 {dimension_numbers = #tpu.dot_dimension_numbers<[1], [1], [0], [0], [0, 0, 1, 0], [], []>} : vector<5x8xf32>, vector<5x8xf32>, vector<5x5xf32> -> vector<5x5xf32>
    %cst_48 = arith.constant dense<0xFF800000> : vector<5xf32>
    %89 = vector.multi_reduction <maximumf>, %88, %cst_48 [1] : vector<5x5xf32> to vector<5xf32>
    %90 = vector.shape_cast %89 : vector<5xf32> to vector<5x1xf32>
    %91 = vector.broadcast %90 : vector<5x1xf32> to vector<5x5xf32>
    %92 = arith.subf %88, %91 : vector<5x5xf32>
    %93 = math.exp %92 : vector<5x5xf32>
    %cst_49 = arith.constant dense<0.000000e+00> : vector<5xf32>
    %94 = vector.multi_reduction <add>, %93, %cst_49 [1] : vector<5x5xf32> to vector<5xf32>
    %95 = vector.shape_cast %94 : vector<5xf32> to vector<5x1xf32>
    %cst_50 = arith.constant 1.000000e+00 : f32
    %96 = vector.broadcast %cst_50 : f32 to vector<5x1xf32>
    %97 = arith.divf %96, %95 : vector<5x1xf32>
    %98 = vector.broadcast %97 : vector<5x1xf32> to vector<5x5xf32>
    %99 = arith.mulf %93, %98 : vector<5x5xf32>
    %cst_51 = arith.constant dense<0.000000e+00> : vector<5x8xf32>
    %100 = tpu.matmul %99, %87, %cst_51 {dimension_numbers = #tpu.dot_dimension_numbers<[1], [0], [0], [1], [0, 0, 1, 1], [], []>} : vector<5x5xf32>, vector<5x8xf32>, vector<5x8xf32> -> vector<5x8xf32>
    %c0_52 = arith.constant 0 : index
    %c16 = arith.constant 16 : index
    %101 = vector.load %arg13[%c0_52, %c16] : memref<5x32xf32, #tpu.memory_space<vmem>>, vector<5x8xf32>
    tpu.vector_store %arg13[%c0_52, %c16], %100 {strides = array<i32>} : memref<5x32xf32, #tpu.memory_space<vmem>>, vector<5x8xf32>,
    %102 = vector.extract_strided_slice %44 {offsets = [0, 24], sizes = [5, 8], strides = [1, 1]} : vector<5x32xf32> to vector<5x8xf32>
    %103 = vector.extract_strided_slice %47 {offsets = [0, 24], sizes = [5, 8], strides = [1, 1]} : vector<5x32xf32> to vector<5x8xf32>
    %104 = vector.extract_strided_slice %50 {offsets = [0, 24], sizes = [5, 8], strides = [1, 1]} : vector<5x32xf32> to vector<5x8xf32>
    %cst_53 = arith.constant dense<0.000000e+00> : vector<5x5xf32>
    %105 = tpu.matmul %102, %103, %cst_53 {dimension_numbers = #tpu.dot_dimension_numbers<[1], [1], [0], [0], [0, 0, 1, 0], [], []>} : vector<5x8xf32>, vector<5x8xf32>, vector<5x5xf32> -> vector<5x5xf32>
    %cst_54 = arith.constant dense<0xFF800000> : vector<5xf32>
    %106 = vector.multi_reduction <maximumf>, %105, %cst_54 [1] : vector<5x5xf32> to vector<5xf32>
    %107 = vector.shape_cast %106 : vector<5xf32> to vector<5x1xf32>
    %108 = vector.broadcast %107 : vector<5x1xf32> to vector<5x5xf32>
    %109 = arith.subf %105, %108 : vector<5x5xf32>
    %110 = math.exp %109 : vector<5x5xf32>
    %cst_55 = arith.constant dense<0.000000e+00> : vector<5xf32>
    %111 = vector.multi_reduction <add>, %110, %cst_55 [1] : vector<5x5xf32> to vector<5xf32>
    %112 = vector.shape_cast %111 : vector<5xf32> to vector<5x1xf32>
    %cst_56 = arith.constant 1.000000e+00 : f32
    %113 = vector.broadcast %cst_56 : f32 to vector<5x1xf32>
    %114 = arith.divf %113, %112 : vector<5x1xf32>
    %115 = vector.broadcast %114 : vector<5x1xf32> to vector<5x5xf32>
    %116 = arith.mulf %110, %115 : vector<5x5xf32>
    %cst_57 = arith.constant dense<0.000000e+00> : vector<5x8xf32>
    %117 = tpu.matmul %116, %104, %cst_57 {dimension_numbers = #tpu.dot_dimension_numbers<[1], [0], [0], [1], [0, 0, 1, 1], [], []>} : vector<5x5xf32>, vector<5x8xf32>, vector<5x8xf32> -> vector<5x8xf32>
    %c0_58 = arith.constant 0 : index
    %c24 = arith.constant 24 : index
    %118 = vector.load %arg13[%c0_58, %c24] : memref<5x32xf32, #tpu.memory_space<vmem>>, vector<5x8xf32>
    tpu.vector_store %arg13[%c0_58, %c24], %117 {strides = array<i32>} : memref<5x32xf32, #tpu.memory_space<vmem>>, vector<5x8xf32>,
    %c0_59 = arith.constant 0 : index
    %c0_60 = arith.constant 0 : index
    %119 = vector.load %arg13[%c0_59, %c0_60] : memref<5x32xf32, #tpu.memory_space<vmem>>, vector<5x32xf32>
    %c0_61 = arith.constant 0 : index
    %c0_62 = arith.constant 0 : index
    %c0_63 = arith.constant 0 : index
    %120 = vector.load %arg7[%c0_61, %c0_62, %c0_63] : memref<2x32x32xf32, #tpu.memory_space<vmem>>, vector<1x32x32xf32>
    %121 = vector.shape_cast %120 : vector<1x32x32xf32> to vector<32x32xf32>
    %cst_64 = arith.constant dense<0.000000e+00> : vector<5x32xf32>
    %122 = tpu.matmul %119, %121, %cst_64 {dimension_numbers = #tpu.dot_dimension_numbers<[1], [0], [0], [1], [0, 0, 1, 1], [], []>} : vector<5x32xf32>, vector<32x32xf32>, vector<5x32xf32> -> vector<5x32xf32>
    %123 = vector.extract_strided_slice %15 {offsets = [2, 0], sizes = [1, 32], strides = [1, 1]} : vector<8x32xf32> to vector<1x32xf32>
    %124 = vector.broadcast %123 : vector<1x32xf32> to vector<5x32xf32>
    %125 = arith.addf %122, %124 : vector<5x32xf32>
    %126 = arith.addf %13, %125 : vector<5x32xf32>
    %127 = vector.extract_strided_slice %15 {offsets = [3, 0], sizes = [1, 32], strides = [1, 1]} : vector<8x32xf32> to vector<1x32xf32>
    %128 = vector.extract_strided_slice %15 {offsets = [4, 0], sizes = [1, 32], strides = [1, 1]} : vector<8x32xf32> to vector<1x32xf32>
    %cst_65 = arith.constant dense<0.000000e+00> : vector<5xf32>
    %129 = vector.multi_reduction <add>, %126, %cst_65 [1] : vector<5x32xf32> to vector<5xf32>
    %130 = vector.shape_cast %129 : vector<5xf32> to vector<5x1xf32>
    %cst_66 = arith.constant 3.200000e+01 : f32
    %131 = vector.broadcast %cst_66 : f32 to vector<5x1xf32>
    %132 = arith.divf %130, %131 : vector<5x1xf32>
    %133 = vector.broadcast %132 : vector<5x1xf32> to vector<5x32xf32>
    %134 = arith.subf %126, %133 : vector<5x32xf32>
    %135 = arith.mulf %134, %134 : vector<5x32xf32>
    %cst_67 = arith.constant dense<0.000000e+00> : vector<5xf32>
    %136 = vector.multi_reduction <add>, %135, %cst_67 [1] : vector<5x32xf32> to vector<5xf32>
    %137 = vector.shape_cast %136 : vector<5xf32> to vector<5x1xf32>
    %cst_68 = arith.constant 3.200000e+01 : f32
    %138 = vector.broadcast %cst_68 : f32 to vector<5x1xf32>
    %139 = arith.divf %137, %138 : vector<5x1xf32>
    %140 = vector.broadcast %132 : vector<5x1xf32> to vector<5x32xf32>
    %141 = arith.subf %126, %140 : vector<5x32xf32>
    %cst_69 = arith.constant 9.99999974E-6 : f32
    %142 = vector.broadcast %cst_69 : f32 to vector<5x1xf32>
    %143 = arith.addf %139, %142 : vector<5x1xf32>
    %144 = math.rsqrt %143 : vector<5x1xf32>
    %145 = vector.broadcast %144 : vector<5x1xf32> to vector<5x32xf32>
    %146 = arith.mulf %141, %145 : vector<5x32xf32>
    %147 = vector.broadcast %127 : vector<1x32xf32> to vector<5x32xf32>
    %148 = arith.mulf %146, %147 : vector<5x32xf32>
    %149 = vector.broadcast %128 : vector<1x32xf32> to vector<5x32xf32>
    %150 = arith.addf %148, %149 : vector<5x32xf32>
    %c0_70 = arith.constant 0 : index
    %c0_71 = arith.constant 0 : index
    %c0_72 = arith.constant 0 : index
    %151 = vector.load %arg8[%c0_70, %c0_71, %c0_72] : memref<2x32x64xf32, #tpu.memory_space<vmem>>, vector<1x32x64xf32>
    %152 = vector.shape_cast %151 : vector<1x32x64xf32> to vector<32x64xf32>
    %cst_73 = arith.constant dense<0.000000e+00> : vector<5x64xf32>
    %153 = tpu.matmul %150, %152, %cst_73 {dimension_numbers = #tpu.dot_dimension_numbers<[1], [0], [0], [1], [0, 0, 1, 1], [], []>} : vector<5x32xf32>, vector<32x64xf32>, vector<5x64xf32> -> vector<5x64xf32>
    %c0_74 = arith.constant 0 : index
    %c0_75 = arith.constant 0 : index
    %c0_76 = arith.constant 0 : index
    %154 = vector.load %arg5[%c0_74, %c0_75, %c0_76] : memref<2x1x64xf32, #tpu.memory_space<vmem>>, vector<1x1x64xf32>
    %155 = vector.shape_cast %154 : vector<1x1x64xf32> to vector<1x64xf32>
    %156 = vector.broadcast %155 : vector<1x64xf32> to vector<5x64xf32>
    %157 = arith.addf %153, %156 : vector<5x64xf32>
    %cst_77 = arith.constant 5.000000e-01 : f32
    %158 = vector.broadcast %cst_77 : f32 to vector<5x64xf32>
    %159 = arith.mulf %158, %157 : vector<5x64xf32>
    %cst_78 = arith.constant 0.707106769 : f32
    %160 = vector.broadcast %cst_78 : f32 to vector<5x64xf32>
    %161 = arith.mulf %157, %160 : vector<5x64xf32>
    %cst_79 = arith.constant 0.000000e+00 : f32
    %162 = vector.broadcast %cst_79 : f32 to vector<5x64xf32>
    %163 = arith.cmpf oge, %161, %162 : vector<5x64xf32>
    %cst_80 = arith.constant 1.000000e+00 : f32
    %cst_81 = arith.constant -1.000000e+00 : f32
    %164 = vector.broadcast %cst_80 : f32 to vector<5x64xf32>
    %165 = vector.broadcast %cst_81 : f32 to vector<5x64xf32>
    %166 = arith.select %163, %164, %165 : vector<5x64xi1>, vector<5x64xf32>
    %167 = math.absf %161 : vector<5x64xf32>
    %cst_82 = arith.constant 0.327591091 : f32
    %168 = vector.broadcast %cst_82 : f32 to vector<5x64xf32>
    %169 = arith.mulf %168, %167 : vector<5x64xf32>
    %cst_83 = arith.constant 1.000000e+00 : f32
    %170 = vector.broadcast %cst_83 : f32 to vector<5x64xf32>
    %171 = arith.addf %170, %169 : vector<5x64xf32>
    %cst_84 = arith.constant 1.000000e+00 : f32
    %172 = vector.broadcast %cst_84 : f32 to vector<5x64xf32>
    %173 = arith.divf %172, %171 : vector<5x64xf32>
    %cst_85 = arith.constant 1.06140542 : f32
    %174 = vector.broadcast %cst_85 : f32 to vector<5x64xf32>
    %175 = arith.mulf %174, %173 : vector<5x64xf32>
    %cst_86 = arith.constant -1.45315206 : f32
    %176 = vector.broadcast %cst_86 : f32 to vector<5x64xf32>
    %177 = arith.addf %175, %176 : vector<5x64xf32>
    %178 = arith.mulf %177, %173 : vector<5x64xf32>
    %cst_87 = arith.constant 1.42141378 : f32
    %179 = vector.broadcast %cst_87 : f32 to vector<5x64xf32>
    %180 = arith.addf %178, %179 : vector<5x64xf32>
    %181 = arith.mulf %180, %173 : vector<5x64xf32>
    %cst_88 = arith.constant -0.284496725 : f32
    %182 = vector.broadcast %cst_88 : f32 to vector<5x64xf32>
    %183 = arith.addf %181, %182 : vector<5x64xf32>
    %184 = arith.mulf %183, %173 : vector<5x64xf32>
    %cst_89 = arith.constant 0.254829586 : f32
    %185 = vector.broadcast %cst_89 : f32 to vector<5x64xf32>
    %186 = arith.addf %184, %185 : vector<5x64xf32>
    %187 = arith.mulf %186, %173 : vector<5x64xf32>
    %cst_90 = arith.constant 0.000000e+00 : f32
    %188 = vector.broadcast %cst_90 : f32 to vector<5x64xf32>
    %189 = arith.subf %188, %167 : vector<5x64xf32>
    %190 = arith.mulf %189, %167 : vector<5x64xf32>
    %191 = math.exp %190 : vector<5x64xf32>
    %192 = arith.mulf %187, %191 : vector<5x64xf32>
    %cst_91 = arith.constant 1.000000e+00 : f32
    %193 = vector.broadcast %cst_91 : f32 to vector<5x64xf32>
    %194 = arith.subf %193, %192 : vector<5x64xf32>
    %195 = arith.mulf %166, %194 : vector<5x64xf32>
    %cst_92 = arith.constant 1.000000e+00 : f32
    %196 = vector.broadcast %cst_92 : f32 to vector<5x64xf32>
    %197 = arith.addf %196, %195 : vector<5x64xf32>
    %198 = arith.mulf %159, %197 : vector<5x64xf32>
    %c0_93 = arith.constant 0 : index
    %c0_94 = arith.constant 0 : index
    %c0_95 = arith.constant 0 : index
    %199 = vector.load %arg9[%c0_93, %c0_94, %c0_95] : memref<2x64x32xf32, #tpu.memory_space<vmem>>, vector<1x64x32xf32>
    %200 = vector.shape_cast %199 : vector<1x64x32xf32> to vector<64x32xf32>
    %cst_96 = arith.constant dense<0.000000e+00> : vector<5x32xf32>
    %201 = tpu.matmul %198, %200, %cst_96 {dimension_numbers = #tpu.dot_dimension_numbers<[1], [0], [0], [1], [0, 0, 1, 1], [], []>} : vector<5x64xf32>, vector<64x32xf32>, vector<5x32xf32> -> vector<5x32xf32>
    %202 = arith.addf %126, %201 : vector<5x32xf32>
    %203 = vector.extract_strided_slice %15 {offsets = [5, 0], sizes = [1, 32], strides = [1, 1]} : vector<8x32xf32> to vector<1x32xf32>
    %204 = vector.broadcast %203 : vector<1x32xf32> to vector<5x32xf32>
    %205 = arith.addf %202, %204 : vector<5x32xf32>
    %c1_97 = arith.constant 1 : index
    %c0_98 = arith.constant 0 : index
    %c0_99 = arith.constant 0 : index
    %206 = vector.load %arg4[%c1_97, %c0_98, %c0_99] : memref<2x8x32xf32, #tpu.memory_space<vmem>>, vector<1x8x32xf32>
    %207 = vector.shape_cast %206 : vector<1x8x32xf32> to vector<8x32xf32>
    %208 = vector.extract_strided_slice %207 {offsets = [0, 0], sizes = [1, 32], strides = [1, 1]} : vector<8x32xf32> to vector<1x32xf32>
    %209 = vector.extract_strided_slice %207 {offsets = [1, 0], sizes = [1, 32], strides = [1, 1]} : vector<8x32xf32> to vector<1x32xf32>
    %cst_100 = arith.constant dense<0.000000e+00> : vector<5xf32>
    %210 = vector.multi_reduction <add>, %205, %cst_100 [1] : vector<5x32xf32> to vector<5xf32>
    %211 = vector.shape_cast %210 : vector<5xf32> to vector<5x1xf32>
    %cst_101 = arith.constant 3.200000e+01 : f32
    %212 = vector.broadcast %cst_101 : f32 to vector<5x1xf32>
    %213 = arith.divf %211, %212 : vector<5x1xf32>
    %214 = vector.broadcast %213 : vector<5x1xf32> to vector<5x32xf32>
    %215 = arith.subf %205, %214 : vector<5x32xf32>
    %216 = arith.mulf %215, %215 : vector<5x32xf32>
    %cst_102 = arith.constant dense<0.000000e+00> : vector<5xf32>
    %217 = vector.multi_reduction <add>, %216, %cst_102 [1] : vector<5x32xf32> to vector<5xf32>
    %218 = vector.shape_cast %217 : vector<5xf32> to vector<5x1xf32>
    %cst_103 = arith.constant 3.200000e+01 : f32
    %219 = vector.broadcast %cst_103 : f32 to vector<5x1xf32>
    %220 = arith.divf %218, %219 : vector<5x1xf32>
    %221 = vector.broadcast %213 : vector<5x1xf32> to vector<5x32xf32>
    %222 = arith.subf %205, %221 : vector<5x32xf32>
    %cst_104 = arith.constant 9.99999974E-6 : f32
    %223 = vector.broadcast %cst_104 : f32 to vector<5x1xf32>
    %224 = arith.addf %220, %223 : vector<5x1xf32>
    %225 = math.rsqrt %224 : vector<5x1xf32>
    %226 = vector.broadcast %225 : vector<5x1xf32> to vector<5x32xf32>
    %227 = arith.mulf %222, %226 : vector<5x32xf32>
    %228 = vector.broadcast %208 : vector<1x32xf32> to vector<5x32xf32>
    %229 = arith.mulf %227, %228 : vector<5x32xf32>
    %230 = vector.broadcast %209 : vector<1x32xf32> to vector<5x32xf32>
    %231 = arith.addf %229, %230 : vector<5x32xf32>
    %c1_105 = arith.constant 1 : index
    %c0_106 = arith.constant 0 : index
    %c0_107 = arith.constant 0 : index
    %c0_108 = arith.constant 0 : index
    %232 = vector.load %arg6[%c1_105, %c0_106, %c0_107, %c0_108] : memref<2x3x32x32xf32, #tpu.memory_space<vmem>>, vector<1x1x32x32xf32>
    %233 = vector.shape_cast %232 : vector<1x1x32x32xf32> to vector<32x32xf32>
    %cst_109 = arith.constant dense<0.000000e+00> : vector<5x32xf32>
    %234 = tpu.matmul %231, %233, %cst_109 {dimension_numbers = #tpu.dot_dimension_numbers<[1], [0], [0], [1], [0, 0, 1, 1], [], []>} : vector<5x32xf32>, vector<32x32xf32>, vector<5x32xf32> -> vector<5x32xf32>
    %cst_110 = arith.constant 0.353553385 : f32
    %235 = vector.broadcast %cst_110 : f32 to vector<5x32xf32>
    %236 = arith.mulf %234, %235 : vector<5x32xf32>
    %c1_111 = arith.constant 1 : index
    %c1_112 = arith.constant 1 : index
    %c0_113 = arith.constant 0 : index
    %c0_114 = arith.constant 0 : index
    %237 = vector.load %arg6[%c1_111, %c1_112, %c0_113, %c0_114] : memref<2x3x32x32xf32, #tpu.memory_space<vmem>>, vector<1x1x32x32xf32>
    %238 = vector.shape_cast %237 : vector<1x1x32x32xf32> to vector<32x32xf32>
    %cst_115 = arith.constant dense<0.000000e+00> : vector<5x32xf32>
    %239 = tpu.matmul %231, %238, %cst_115 {dimension_numbers = #tpu.dot_dimension_numbers<[1], [0], [0], [1], [0, 0, 1, 1], [], []>} : vector<5x32xf32>, vector<32x32xf32>, vector<5x32xf32> -> vector<5x32xf32>
    %c1_116 = arith.constant 1 : index
    %c2_117 = arith.constant 2 : index
    %c0_118 = arith.constant 0 : index
    %c0_119 = arith.constant 0 : index
    %240 = vector.load %arg6[%c1_116, %c2_117, %c0_118, %c0_119] : memref<2x3x32x32xf32, #tpu.memory_space<vmem>>, vector<1x1x32x32xf32>
    %241 = vector.shape_cast %240 : vector<1x1x32x32xf32> to vector<32x32xf32>
    %cst_120 = arith.constant dense<0.000000e+00> : vector<5x32xf32>
    %242 = tpu.matmul %231, %241, %cst_120 {dimension_numbers = #tpu.dot_dimension_numbers<[1], [0], [0], [1], [0, 0, 1, 1], [], []>} : vector<5x32xf32>, vector<32x32xf32>, vector<5x32xf32> -> vector<5x32xf32>
    %243 = vector.extract_strided_slice %236 {offsets = [0, 0], sizes = [5, 8], strides = [1, 1]} : vector<5x32xf32> to vector<5x8xf32>
    %244 = vector.extract_strided_slice %239 {offsets = [0, 0], sizes = [5, 8], strides = [1, 1]} : vector<5x32xf32> to vector<5x8xf32>
    %245 = vector.extract_strided_slice %242 {offsets = [0, 0], sizes = [5, 8], strides = [1, 1]} : vector<5x32xf32> to vector<5x8xf32>
    %cst_121 = arith.constant dense<0.000000e+00> : vector<5x5xf32>
    %246 = tpu.matmul %243, %244, %cst_121 {dimension_numbers = #tpu.dot_dimension_numbers<[1], [1], [0], [0], [0, 0, 1, 0], [], []>} : vector<5x8xf32>, vector<5x8xf32>, vector<5x5xf32> -> vector<5x5xf32>
    %cst_122 = arith.constant dense<0xFF800000> : vector<5xf32>
    %247 = vector.multi_reduction <maximumf>, %246, %cst_122 [1] : vector<5x5xf32> to vector<5xf32>
    %248 = vector.shape_cast %247 : vector<5xf32> to vector<5x1xf32>
    %249 = vector.broadcast %248 : vector<5x1xf32> to vector<5x5xf32>
    %250 = arith.subf %246, %249 : vector<5x5xf32>
    %251 = math.exp %250 : vector<5x5xf32>
    %cst_123 = arith.constant dense<0.000000e+00> : vector<5xf32>
    %252 = vector.multi_reduction <add>, %251, %cst_123 [1] : vector<5x5xf32> to vector<5xf32>
    %253 = vector.shape_cast %252 : vector<5xf32> to vector<5x1xf32>
    %cst_124 = arith.constant 1.000000e+00 : f32
    %254 = vector.broadcast %cst_124 : f32 to vector<5x1xf32>
    %255 = arith.divf %254, %253 : vector<5x1xf32>
    %256 = vector.broadcast %255 : vector<5x1xf32> to vector<5x5xf32>
    %257 = arith.mulf %251, %256 : vector<5x5xf32>
    %cst_125 = arith.constant dense<0.000000e+00> : vector<5x8xf32>
    %258 = tpu.matmul %257, %245, %cst_125 {dimension_numbers = #tpu.dot_dimension_numbers<[1], [0], [0], [1], [0, 0, 1, 1], [], []>} : vector<5x5xf32>, vector<5x8xf32>, vector<5x8xf32> -> vector<5x8xf32>
    %c0_126 = arith.constant 0 : index
    %c0_127 = arith.constant 0 : index
    %259 = vector.load %arg13[%c0_126, %c0_127] : memref<5x32xf32, #tpu.memory_space<vmem>>, vector<5x8xf32>
    tpu.vector_store %arg13[%c0_126, %c0_127], %258 {strides = array<i32>} : memref<5x32xf32, #tpu.memory_space<vmem>>, vector<5x8xf32>,
    %260 = vector.extract_strided_slice %236 {offsets = [0, 8], sizes = [5, 8], strides = [1, 1]} : vector<5x32xf32> to vector<5x8xf32>
    %261 = vector.extract_strided_slice %239 {offsets = [0, 8], sizes = [5, 8], strides = [1, 1]} : vector<5x32xf32> to vector<5x8xf32>
    %262 = vector.extract_strided_slice %242 {offsets = [0, 8], sizes = [5, 8], strides = [1, 1]} : vector<5x32xf32> to vector<5x8xf32>
    %cst_128 = arith.constant dense<0.000000e+00> : vector<5x5xf32>
    %263 = tpu.matmul %260, %261, %cst_128 {dimension_numbers = #tpu.dot_dimension_numbers<[1], [1], [0], [0], [0, 0, 1, 0], [], []>} : vector<5x8xf32>, vector<5x8xf32>, vector<5x5xf32> -> vector<5x5xf32>
    %cst_129 = arith.constant dense<0xFF800000> : vector<5xf32>
    %264 = vector.multi_reduction <maximumf>, %263, %cst_129 [1] : vector<5x5xf32> to vector<5xf32>
    %265 = vector.shape_cast %264 : vector<5xf32> to vector<5x1xf32>
    %266 = vector.broadcast %265 : vector<5x1xf32> to vector<5x5xf32>
    %267 = arith.subf %263, %266 : vector<5x5xf32>
    %268 = math.exp %267 : vector<5x5xf32>
    %cst_130 = arith.constant dense<0.000000e+00> : vector<5xf32>
    %269 = vector.multi_reduction <add>, %268, %cst_130 [1] : vector<5x5xf32> to vector<5xf32>
    %270 = vector.shape_cast %269 : vector<5xf32> to vector<5x1xf32>
    %cst_131 = arith.constant 1.000000e+00 : f32
    %271 = vector.broadcast %cst_131 : f32 to vector<5x1xf32>
    %272 = arith.divf %271, %270 : vector<5x1xf32>
    %273 = vector.broadcast %272 : vector<5x1xf32> to vector<5x5xf32>
    %274 = arith.mulf %268, %273 : vector<5x5xf32>
    %cst_132 = arith.constant dense<0.000000e+00> : vector<5x8xf32>
    %275 = tpu.matmul %274, %262, %cst_132 {dimension_numbers = #tpu.dot_dimension_numbers<[1], [0], [0], [1], [0, 0, 1, 1], [], []>} : vector<5x5xf32>, vector<5x8xf32>, vector<5x8xf32> -> vector<5x8xf32>
    %c0_133 = arith.constant 0 : index
    %c8_134 = arith.constant 8 : index
    %276 = vector.load %arg13[%c0_133, %c8_134] : memref<5x32xf32, #tpu.memory_space<vmem>>, vector<5x8xf32>
    tpu.vector_store %arg13[%c0_133, %c8_134], %275 {strides = array<i32>} : memref<5x32xf32, #tpu.memory_space<vmem>>, vector<5x8xf32>,
    %277 = vector.extract_strided_slice %236 {offsets = [0, 16], sizes = [5, 8], strides = [1, 1]} : vector<5x32xf32> to vector<5x8xf32>
    %278 = vector.extract_strided_slice %239 {offsets = [0, 16], sizes = [5, 8], strides = [1, 1]} : vector<5x32xf32> to vector<5x8xf32>
    %279 = vector.extract_strided_slice %242 {offsets = [0, 16], sizes = [5, 8], strides = [1, 1]} : vector<5x32xf32> to vector<5x8xf32>
    %cst_135 = arith.constant dense<0.000000e+00> : vector<5x5xf32>
    %280 = tpu.matmul %277, %278, %cst_135 {dimension_numbers = #tpu.dot_dimension_numbers<[1], [1], [0], [0], [0, 0, 1, 0], [], []>} : vector<5x8xf32>, vector<5x8xf32>, vector<5x5xf32> -> vector<5x5xf32>
    %cst_136 = arith.constant dense<0xFF800000> : vector<5xf32>
    %281 = vector.multi_reduction <maximumf>, %280, %cst_136 [1] : vector<5x5xf32> to vector<5xf32>
    %282 = vector.shape_cast %281 : vector<5xf32> to vector<5x1xf32>
    %283 = vector.broadcast %282 : vector<5x1xf32> to vector<5x5xf32>
    %284 = arith.subf %280, %283 : vector<5x5xf32>
    %285 = math.exp %284 : vector<5x5xf32>
    %cst_137 = arith.constant dense<0.000000e+00> : vector<5xf32>
    %286 = vector.multi_reduction <add>, %285, %cst_137 [1] : vector<5x5xf32> to vector<5xf32>
    %287 = vector.shape_cast %286 : vector<5xf32> to vector<5x1xf32>
    %cst_138 = arith.constant 1.000000e+00 : f32
    %288 = vector.broadcast %cst_138 : f32 to vector<5x1xf32>
    %289 = arith.divf %288, %287 : vector<5x1xf32>
    %290 = vector.broadcast %289 : vector<5x1xf32> to vector<5x5xf32>
    %291 = arith.mulf %285, %290 : vector<5x5xf32>
    %cst_139 = arith.constant dense<0.000000e+00> : vector<5x8xf32>
    %292 = tpu.matmul %291, %279, %cst_139 {dimension_numbers = #tpu.dot_dimension_numbers<[1], [0], [0], [1], [0, 0, 1, 1], [], []>} : vector<5x5xf32>, vector<5x8xf32>, vector<5x8xf32> -> vector<5x8xf32>
    %c0_140 = arith.constant 0 : index
    %c16_141 = arith.constant 16 : index
    %293 = vector.load %arg13[%c0_140, %c16_141] : memref<5x32xf32, #tpu.memory_space<vmem>>, vector<5x8xf32>
    tpu.vector_store %arg13[%c0_140, %c16_141], %292 {strides = array<i32>} : memref<5x32xf32, #tpu.memory_space<vmem>>, vector<5x8xf32>,
    %294 = vector.extract_strided_slice %236 {offsets = [0, 24], sizes = [5, 8], strides = [1, 1]} : vector<5x32xf32> to vector<5x8xf32>
    %295 = vector.extract_strided_slice %239 {offsets = [0, 24], sizes = [5, 8], strides = [1, 1]} : vector<5x32xf32> to vector<5x8xf32>
    %296 = vector.extract_strided_slice %242 {offsets = [0, 24], sizes = [5, 8], strides = [1, 1]} : vector<5x32xf32> to vector<5x8xf32>
    %cst_142 = arith.constant dense<0.000000e+00> : vector<5x5xf32>
    %297 = tpu.matmul %294, %295, %cst_142 {dimension_numbers = #tpu.dot_dimension_numbers<[1], [1], [0], [0], [0, 0, 1, 0], [], []>} : vector<5x8xf32>, vector<5x8xf32>, vector<5x5xf32> -> vector<5x5xf32>
    %cst_143 = arith.constant dense<0xFF800000> : vector<5xf32>
    %298 = vector.multi_reduction <maximumf>, %297, %cst_143 [1] : vector<5x5xf32> to vector<5xf32>
    %299 = vector.shape_cast %298 : vector<5xf32> to vector<5x1xf32>
    %300 = vector.broadcast %299 : vector<5x1xf32> to vector<5x5xf32>
    %301 = arith.subf %297, %300 : vector<5x5xf32>
    %302 = math.exp %301 : vector<5x5xf32>
    %cst_144 = arith.constant dense<0.000000e+00> : vector<5xf32>
    %303 = vector.multi_reduction <add>, %302, %cst_144 [1] : vector<5x5xf32> to vector<5xf32>
    %304 = vector.shape_cast %303 : vector<5xf32> to vector<5x1xf32>
    %cst_145 = arith.constant 1.000000e+00 : f32
    %305 = vector.broadcast %cst_145 : f32 to vector<5x1xf32>
    %306 = arith.divf %305, %304 : vector<5x1xf32>
    %307 = vector.broadcast %306 : vector<5x1xf32> to vector<5x5xf32>
    %308 = arith.mulf %302, %307 : vector<5x5xf32>
    %cst_146 = arith.constant dense<0.000000e+00> : vector<5x8xf32>
    %309 = tpu.matmul %308, %296, %cst_146 {dimension_numbers = #tpu.dot_dimension_numbers<[1], [0], [0], [1], [0, 0, 1, 1], [], []>} : vector<5x5xf32>, vector<5x8xf32>, vector<5x8xf32> -> vector<5x8xf32>
    %c0_147 = arith.constant 0 : index
    %c24_148 = arith.constant 24 : index
    %310 = vector.load %arg13[%c0_147, %c24_148] : memref<5x32xf32, #tpu.memory_space<vmem>>, vector<5x8xf32>
    tpu.vector_store %arg13[%c0_147, %c24_148], %309 {strides = array<i32>} : memref<5x32xf32, #tpu.memory_space<vmem>>, vector<5x8xf32>,
    %c0_149 = arith.constant 0 : index
    %c0_150 = arith.constant 0 : index
    %311 = vector.load %arg13[%c0_149, %c0_150] : memref<5x32xf32, #tpu.memory_space<vmem>>, vector<5x32xf32>
    %c1_151 = arith.constant 1 : index
    %c0_152 = arith.constant 0 : index
    %c0_153 = arith.constant 0 : index
    %312 = vector.load %arg7[%c1_151, %c0_152, %c0_153] : memref<2x32x32xf32, #tpu.memory_space<vmem>>, vector<1x32x32xf32>
    %313 = vector.shape_cast %312 : vector<1x32x32xf32> to vector<32x32xf32>
    %cst_154 = arith.constant dense<0.000000e+00> : vector<5x32xf32>
    %314 = tpu.matmul %311, %313, %cst_154 {dimension_numbers = #tpu.dot_dimension_numbers<[1], [0], [0], [1], [0, 0, 1, 1], [], []>} : vector<5x32xf32>, vector<32x32xf32>, vector<5x32xf32> -> vector<5x32xf32>
    %315 = vector.extract_strided_slice %207 {offsets = [2, 0], sizes = [1, 32], strides = [1, 1]} : vector<8x32xf32> to vector<1x32xf32>
    %316 = vector.broadcast %315 : vector<1x32xf32> to vector<5x32xf32>
    %317 = arith.addf %314, %316 : vector<5x32xf32>
    %318 = arith.addf %205, %317 : vector<5x32xf32>
    %319 = vector.extract_strided_slice %207 {offsets = [3, 0], sizes = [1, 32], strides = [1, 1]} : vector<8x32xf32> to vector<1x32xf32>
    %320 = vector.extract_strided_slice %207 {offsets = [4, 0], sizes = [1, 32], strides = [1, 1]} : vector<8x32xf32> to vector<1x32xf32>
    %cst_155 = arith.constant dense<0.000000e+00> : vector<5xf32>
    %321 = vector.multi_reduction <add>, %318, %cst_155 [1] : vector<5x32xf32> to vector<5xf32>
    %322 = vector.shape_cast %321 : vector<5xf32> to vector<5x1xf32>
    %cst_156 = arith.constant 3.200000e+01 : f32
    %323 = vector.broadcast %cst_156 : f32 to vector<5x1xf32>
    %324 = arith.divf %322, %323 : vector<5x1xf32>
    %325 = vector.broadcast %324 : vector<5x1xf32> to vector<5x32xf32>
    %326 = arith.subf %318, %325 : vector<5x32xf32>
    %327 = arith.mulf %326, %326 : vector<5x32xf32>
    %cst_157 = arith.constant dense<0.000000e+00> : vector<5xf32>
    %328 = vector.multi_reduction <add>, %327, %cst_157 [1] : vector<5x32xf32> to vector<5xf32>
    %329 = vector.shape_cast %328 : vector<5xf32> to vector<5x1xf32>
    %cst_158 = arith.constant 3.200000e+01 : f32
    %330 = vector.broadcast %cst_158 : f32 to vector<5x1xf32>
    %331 = arith.divf %329, %330 : vector<5x1xf32>
    %332 = vector.broadcast %324 : vector<5x1xf32> to vector<5x32xf32>
    %333 = arith.subf %318, %332 : vector<5x32xf32>
    %cst_159 = arith.constant 9.99999974E-6 : f32
    %334 = vector.broadcast %cst_159 : f32 to vector<5x1xf32>
    %335 = arith.addf %331, %334 : vector<5x1xf32>
    %336 = math.rsqrt %335 : vector<5x1xf32>
    %337 = vector.broadcast %336 : vector<5x1xf32> to vector<5x32xf32>
    %338 = arith.mulf %333, %337 : vector<5x32xf32>
    %339 = vector.broadcast %319 : vector<1x32xf32> to vector<5x32xf32>
    %340 = arith.mulf %338, %339 : vector<5x32xf32>
    %341 = vector.broadcast %320 : vector<1x32xf32> to vector<5x32xf32>
    %342 = arith.addf %340, %341 : vector<5x32xf32>
    %c1_160 = arith.constant 1 : index
    %c0_161 = arith.constant 0 : index
    %c0_162 = arith.constant 0 : index
    %343 = vector.load %arg8[%c1_160, %c0_161, %c0_162] : memref<2x32x64xf32, #tpu.memory_space<vmem>>, vector<1x32x64xf32>
    %344 = vector.shape_cast %343 : vector<1x32x64xf32> to vector<32x64xf32>
    %cst_163 = arith.constant dense<0.000000e+00> : vector<5x64xf32>
    %345 = tpu.matmul %342, %344, %cst_163 {dimension_numbers = #tpu.dot_dimension_numbers<[1], [0], [0], [1], [0, 0, 1, 1], [], []>} : vector<5x32xf32>, vector<32x64xf32>, vector<5x64xf32> -> vector<5x64xf32>
    %c1_164 = arith.constant 1 : index
    %c0_165 = arith.constant 0 : index
    %c0_166 = arith.constant 0 : index
    %346 = vector.load %arg5[%c1_164, %c0_165, %c0_166] : memref<2x1x64xf32, #tpu.memory_space<vmem>>, vector<1x1x64xf32>
    %347 = vector.shape_cast %346 : vector<1x1x64xf32> to vector<1x64xf32>
    %348 = vector.broadcast %347 : vector<1x64xf32> to vector<5x64xf32>
    %349 = arith.addf %345, %348 : vector<5x64xf32>
    %cst_167 = arith.constant 5.000000e-01 : f32
    %350 = vector.broadcast %cst_167 : f32 to vector<5x64xf32>
    %351 = arith.mulf %350, %349 : vector<5x64xf32>
    %cst_168 = arith.constant 0.707106769 : f32
    %352 = vector.broadcast %cst_168 : f32 to vector<5x64xf32>
    %353 = arith.mulf %349, %352 : vector<5x64xf32>
    %cst_169 = arith.constant 0.000000e+00 : f32
    %354 = vector.broadcast %cst_169 : f32 to vector<5x64xf32>
    %355 = arith.cmpf oge, %353, %354 : vector<5x64xf32>
    %cst_170 = arith.constant 1.000000e+00 : f32
    %cst_171 = arith.constant -1.000000e+00 : f32
    %356 = vector.broadcast %cst_170 : f32 to vector<5x64xf32>
    %357 = vector.broadcast %cst_171 : f32 to vector<5x64xf32>
    %358 = arith.select %355, %356, %357 : vector<5x64xi1>, vector<5x64xf32>
    %359 = math.absf %353 : vector<5x64xf32>
    %cst_172 = arith.constant 0.327591091 : f32
    %360 = vector.broadcast %cst_172 : f32 to vector<5x64xf32>
    %361 = arith.mulf %360, %359 : vector<5x64xf32>
    %cst_173 = arith.constant 1.000000e+00 : f32
    %362 = vector.broadcast %cst_173 : f32 to vector<5x64xf32>
    %363 = arith.addf %362, %361 : vector<5x64xf32>
    %cst_174 = arith.constant 1.000000e+00 : f32
    %364 = vector.broadcast %cst_174 : f32 to vector<5x64xf32>
    %365 = arith.divf %364, %363 : vector<5x64xf32>
    %cst_175 = arith.constant 1.06140542 : f32
    %366 = vector.broadcast %cst_175 : f32 to vector<5x64xf32>
    %367 = arith.mulf %366, %365 : vector<5x64xf32>
    %cst_176 = arith.constant -1.45315206 : f32
    %368 = vector.broadcast %cst_176 : f32 to vector<5x64xf32>
    %369 = arith.addf %367, %368 : vector<5x64xf32>
    %370 = arith.mulf %369, %365 : vector<5x64xf32>
    %cst_177 = arith.constant 1.42141378 : f32
    %371 = vector.broadcast %cst_177 : f32 to vector<5x64xf32>
    %372 = arith.addf %370, %371 : vector<5x64xf32>
    %373 = arith.mulf %372, %365 : vector<5x64xf32>
    %cst_178 = arith.constant -0.284496725 : f32
    %374 = vector.broadcast %cst_178 : f32 to vector<5x64xf32>
    %375 = arith.addf %373, %374 : vector<5x64xf32>
    %376 = arith.mulf %375, %365 : vector<5x64xf32>
    %cst_179 = arith.constant 0.254829586 : f32
    %377 = vector.broadcast %cst_179 : f32 to vector<5x64xf32>
    %378 = arith.addf %376, %377 : vector<5x64xf32>
    %379 = arith.mulf %378, %365 : vector<5x64xf32>
    %cst_180 = arith.constant 0.000000e+00 : f32
    %380 = vector.broadcast %cst_180 : f32 to vector<5x64xf32>
    %381 = arith.subf %380, %359 : vector<5x64xf32>
    %382 = arith.mulf %381, %359 : vector<5x64xf32>
    %383 = math.exp %382 : vector<5x64xf32>
    %384 = arith.mulf %379, %383 : vector<5x64xf32>
    %cst_181 = arith.constant 1.000000e+00 : f32
    %385 = vector.broadcast %cst_181 : f32 to vector<5x64xf32>
    %386 = arith.subf %385, %384 : vector<5x64xf32>
    %387 = arith.mulf %358, %386 : vector<5x64xf32>
    %cst_182 = arith.constant 1.000000e+00 : f32
    %388 = vector.broadcast %cst_182 : f32 to vector<5x64xf32>
    %389 = arith.addf %388, %387 : vector<5x64xf32>
    %390 = arith.mulf %351, %389 : vector<5x64xf32>
    %c1_183 = arith.constant 1 : index
    %c0_184 = arith.constant 0 : index
    %c0_185 = arith.constant 0 : index
    %391 = vector.load %arg9[%c1_183, %c0_184, %c0_185] : memref<2x64x32xf32, #tpu.memory_space<vmem>>, vector<1x64x32xf32>
    %392 = vector.shape_cast %391 : vector<1x64x32xf32> to vector<64x32xf32>
    %cst_186 = arith.constant dense<0.000000e+00> : vector<5x32xf32>
    %393 = tpu.matmul %390, %392, %cst_186 {dimension_numbers = #tpu.dot_dimension_numbers<[1], [0], [0], [1], [0, 0, 1, 1], [], []>} : vector<5x64xf32>, vector<64x32xf32>, vector<5x32xf32> -> vector<5x32xf32>
    %394 = arith.addf %318, %393 : vector<5x32xf32>
    %395 = vector.extract_strided_slice %207 {offsets = [5, 0], sizes = [1, 32], strides = [1, 1]} : vector<8x32xf32> to vector<1x32xf32>
    %396 = vector.broadcast %395 : vector<1x32xf32> to vector<5x32xf32>
    %397 = arith.addf %394, %396 : vector<5x32xf32>
    %c0_187 = arith.constant 0 : index
    %c0_188 = arith.constant 0 : index
    %398 = vector.load %arg10[%c0_187, %c0_188] : memref<40x128xf32, #tpu.memory_space<vmem>>, vector<40x128xf32>
    %399 = vector.extract_strided_slice %397 {offsets = [0, 0], sizes = [1, 32], strides = [1, 1]} : vector<5x32xf32> to vector<1x32xf32>
    %400 = vector.extract_strided_slice %0 {offsets = [1, 0], sizes = [1, 32], strides = [1, 1]} : vector<8x32xf32> to vector<1x32xf32>
    %401 = vector.extract_strided_slice %0 {offsets = [2, 0], sizes = [1, 32], strides = [1, 1]} : vector<8x32xf32> to vector<1x32xf32>
    %cst_189 = arith.constant dense<0.000000e+00> : vector<1xf32>
    %402 = vector.multi_reduction <add>, %399, %cst_189 [1] : vector<1x32xf32> to vector<1xf32>
    %403 = vector.shape_cast %402 : vector<1xf32> to vector<1x1xf32>
    %cst_190 = arith.constant 3.200000e+01 : f32
    %404 = vector.broadcast %cst_190 : f32 to vector<1x1xf32>
    %405 = arith.divf %403, %404 : vector<1x1xf32>
    %406 = vector.broadcast %405 : vector<1x1xf32> to vector<1x32xf32>
    %407 = arith.subf %399, %406 : vector<1x32xf32>
    %408 = arith.mulf %407, %407 : vector<1x32xf32>
    %cst_191 = arith.constant dense<0.000000e+00> : vector<1xf32>
    %409 = vector.multi_reduction <add>, %408, %cst_191 [1] : vector<1x32xf32> to vector<1xf32>
    %410 = vector.shape_cast %409 : vector<1xf32> to vector<1x1xf32>
    %cst_192 = arith.constant 3.200000e+01 : f32
    %411 = vector.broadcast %cst_192 : f32 to vector<1x1xf32>
    %412 = arith.divf %410, %411 : vector<1x1xf32>
    %413 = vector.broadcast %405 : vector<1x1xf32> to vector<1x32xf32>
    %414 = arith.subf %399, %413 : vector<1x32xf32>
    %cst_193 = arith.constant 9.99999974E-6 : f32
    %415 = vector.broadcast %cst_193 : f32 to vector<1x1xf32>
    %416 = arith.addf %412, %415 : vector<1x1xf32>
    %417 = math.rsqrt %416 : vector<1x1xf32>
    %418 = vector.broadcast %417 : vector<1x1xf32> to vector<1x32xf32>
    %419 = arith.mulf %414, %418 : vector<1x32xf32>
    %420 = arith.mulf %419, %400 : vector<1x32xf32>
    %421 = arith.addf %420, %401 : vector<1x32xf32>
    %422 = vector.extract_strided_slice %398 {offsets = [0, 0], sizes = [32, 128], strides = [1, 1]} : vector<40x128xf32> to vector<32x128xf32>
    %cst_194 = arith.constant dense<0.000000e+00> : vector<1x128xf32>
    %423 = tpu.matmul %421, %422, %cst_194 {dimension_numbers = #tpu.dot_dimension_numbers<[1], [0], [0], [1], [0, 0, 1, 1], [], []>} : vector<1x32xf32>, vector<32x128xf32>, vector<1x128xf32> -> vector<1x128xf32>
    %424 = vector.extract_strided_slice %398 {offsets = [32, 0], sizes = [1, 128], strides = [1, 1]} : vector<40x128xf32> to vector<1x128xf32>
    %425 = arith.addf %423, %424 : vector<1x128xf32>
    %c0_195 = arith.constant 0 : index
    %c0_196 = arith.constant 0 : index
    %c0_197 = arith.constant 0 : index
    %426 = vector.load %arg11[%c0_195, %c0_196, %c0_197] : memref<1x1x128xf32, #tpu.memory_space<vmem>>, vector<1x1x128xf32>
    %427 = vector.shape_cast %426 : vector<1x1x128xf32> to vector<1x128xf32>
    %428 = vector.shape_cast %425 : vector<1x128xf32> to vector<1x1x128xf32>
    tpu.vector_store %arg11[%c0_195, %c0_196, %c0_197], %428 {strides = array<i32>} : memref<1x1x128xf32, #tpu.memory_space<vmem>>, vector<1x1x128xf32>,
    return
  }
  func.func @transform_0(%arg0: i32) -> (i32, i32, i32) {
    %c0_i32 = arith.constant 0 : i32
    %c0_i32_0 = arith.constant 0 : i32
    %c0_i32_1 = arith.constant 0 : i32
    return %arg0, %c0_i32, %c0_i32_0 : i32, i32, i32
  }
  func.func @transform_1(%arg0: i32) -> (i32, i32) {
    %c0_i32 = arith.constant 0 : i32
    %c0_i32_0 = arith.constant 0 : i32
    %c0_i32_1 = arith.constant 0 : i32
    return %c0_i32, %c0_i32_0 : i32, i32
  }
  func.func @transform_2(%arg0: i32) -> (i32, i32) {
    %c0_i32 = arith.constant 0 : i32
    %c0_i32_0 = arith.constant 0 : i32
    %c0_i32_1 = arith.constant 0 : i32
    return %c0_i32, %c0_i32_0 : i32, i32
  }
  func.func @transform_3(%arg0: i32) -> (i32, i32, i32) {
    %c0_i32 = arith.constant 0 : i32
    %c0_i32_0 = arith.constant 0 : i32
    %c0_i32_1 = arith.constant 0 : i32
    %c0_i32_2 = arith.constant 0 : i32
    return %c0_i32, %c0_i32_0, %c0_i32_1 : i32, i32, i32
  }
  func.func @transform_4(%arg0: i32) -> (i32, i32, i32) {
    %c0_i32 = arith.constant 0 : i32
    %c0_i32_0 = arith.constant 0 : i32
    %c0_i32_1 = arith.constant 0 : i32
    %c0_i32_2 = arith.constant 0 : i32
    return %c0_i32, %c0_i32_0, %c0_i32_1 : i32, i32, i32
  }
  func.func @transform_5(%arg0: i32) -> (i32, i32, i32, i32) {
    %c0_i32 = arith.constant 0 : i32
    %c0_i32_0 = arith.constant 0 : i32
    %c0_i32_1 = arith.constant 0 : i32
    %c0_i32_2 = arith.constant 0 : i32
    %c0_i32_3 = arith.constant 0 : i32
    return %c0_i32, %c0_i32_0, %c0_i32_1, %c0_i32_2 : i32, i32, i32, i32
  }
  func.func @transform_6(%arg0: i32) -> (i32, i32, i32) {
    %c0_i32 = arith.constant 0 : i32
    %c0_i32_0 = arith.constant 0 : i32
    %c0_i32_1 = arith.constant 0 : i32
    %c0_i32_2 = arith.constant 0 : i32
    return %c0_i32, %c0_i32_0, %c0_i32_1 : i32, i32, i32
  }
  func.func @transform_7(%arg0: i32) -> (i32, i32, i32) {
    %c0_i32 = arith.constant 0 : i32
    %c0_i32_0 = arith.constant 0 : i32
    %c0_i32_1 = arith.constant 0 : i32
    %c0_i32_2 = arith.constant 0 : i32
    return %c0_i32, %c0_i32_0, %c0_i32_1 : i32, i32, i32
  }
  func.func @transform_8(%arg0: i32) -> (i32, i32, i32) {
    %c0_i32 = arith.constant 0 : i32
    %c0_i32_0 = arith.constant 0 : i32
    %c0_i32_1 = arith.constant 0 : i32
    %c0_i32_2 = arith.constant 0 : i32
    return %c0_i32, %c0_i32_0, %c0_i32_1 : i32, i32, i32
  }
  func.func @transform_9(%arg0: i32) -> (i32, i32) {
    %c0_i32 = arith.constant 0 : i32
    %c0_i32_0 = arith.constant 0 : i32
    %c0_i32_1 = arith.constant 0 : i32
    return %c0_i32, %c0_i32_0 : i32, i32
  }
  func.func @transform_10(%arg0: i32) -> (i32, i32, i32) {
    %c0_i32 = arith.constant 0 : i32
    %c0_i32_0 = arith.constant 0 : i32
    %c0_i32_1 = arith.constant 0 : i32
    return %arg0, %c0_i32, %c0_i32_0 : i32, i32, i32
  }
}

</mosaic_0001>

<bundles_post_ra>
// kernel: unimodal_vit_forward.1
= control target key start
LH: loop header
LB: loop body
LE: loop exit
PB: predicated region body
PF: predicated region fallthrough
CT: control target
= control target key end

     0   :  { %15 = vsyncpa [#allocation5], 0  ;;  %s4651_s0 = inlined_call_operand.vmem [shape: f32[2,4,256], index: 0, kind: input, shape index: {}]   ;;  %s4652_s1 = inlined_call_operand.vmem [shape: f32[256,32], index: 1, kind: input, shape index: {}]   ;;  %s4653_s2 = inlined_call_operand.vmem [shape: f32[8,32], index: 2, kind: input, shape index: {}]   ;;  %s4654_s3 = inlined_call_operand.vmem [shape: f32[2,8,32], index: 3, kind: input, shape index: {}]   ;;  %s4655_s4 = inlined_call_operand.vmem [shape: f32[2,1,64], index: 4, kind: input, shape index: {}]   ;;  %s4656_s5 = inlined_call_operand.vmem [shape: f32[2,3,32,32], index: 5, kind: input, shape index: {}]   ;;  %s4657_s6 = inlined_call_operand.vmem [shape: f32[2,32,32], index: 6, kind: input, shape index: {}]   ;;  %s4658_s7 = inlined_call_operand.vmem [shape: f32[2,32,64], index: 7, kind: input, shape index: {}]   ;;  %s4659_s8 = inlined_call_operand.vmem [shape: f32[2,64,32], index: 8, kind: input, shape index: {}]   ;;  %s4660_s9 = inlined_call_operand.vmem [shape: f32[40,128], index: 9, kind: input, shape index: {}]   ;;  %s4661_s10 = inlined_call_operand.hbm [shape: f32[2,1,128], index: 10, kind: output, shape index: {}]  }
   0x1   :  { %17 = vsyncpa [#allocation5 + $0x1], 0  ;;  %s3962_s13 = smov 0   ;;  %s3964_s14 = smov 0  }
   0x2   :  { %s3966_s15 = smov 0   ;;  %s3968_s16 = smov 0  }
   0x3 LB: > { %s3983_s17 = sadd.s32 4294967295, %s3894_s16   ;;  %s3136_s18 = sadd.s32 4294967294, %s3894_s16   ;;  %s3894_s16 = sphi %s3968_s16, %s4675_s16   ;;  %s3890_s15 = sphi %s3966_s15, %s4674_s15   ;;  %s3886_s14 = sphi %s3964_s14, %s4673_s14   ;;  %s3882_s13 = sphi %s3962_s13, %s4672_s13  }
   0x4   : > { %s3987_s19 = sadd.s32 1, %s3894_s16   ;;  %s245_s20 = sadd.s32 1, %s3890_s15 }
   0x5   : > { %s242_s21 = ssub.s32 %s3894_s16, %s3987_s19  ;;  %p255_p0 = scmp.ne.s32.totalorder %s3890_s15, %s3886_s14 }
   0x6   : > { %p243_p1 = scmp.eq.s32.totalorder %s242_s21, 0  ;;  %p256_p2 = scmp.eq.s32.totalorder %s3983_s17, 1 }
   0x7   : > { %p261_p3 = scmp.ne.s32.totalorder %s3886_s14, %s3882_s13  ;;  %p262_p4 = scmp.eq.s32.totalorder %s3136_s18, 1 }
   0x8   : > { %s3998_s22 = scalar_select %p243_p1, %s3890_s15, %s245_s20  }
   0x9   : > { %p4000_p5 = por %p256_p2, %p255_p0  ;;  %p4004_p6 = por %p262_p4, %p261_p3 }
   0xa   : > { %4665 = sst [smem:[#allocation7_spill]] %s3998_s22  ;;  %p3139_p7 = scmp.ge.s32.totalorder %s3894_s16, 1 }
   0xb   : > { %p315_p8 = scmp.lt.s32.totalorder %s3894_s16, 3 }
   0xd   : > { %p316_p9 = pnand %p3139_p7, %p315_p8 }
   0xe   : > { %v375_v0 = vld [vmem:[%s4652_s1 + $0x80] sm:$0xff] (!%p316_p9)  ;;  %v376_v1 = vld [vmem:[%s4652_s1 + $0x88] sm:$0xff] (!%p316_p9)  ;;  %p352_p10 = scmp.lt.s32.totalorder (!%p316_p9), %s3983_s17, 1  ;;  %v377_v5 = vld [vmem:[%s4652_s1 + $0x90] sm:$0xff] (!%p316_p9)  ;;  %vm391_vm0 = vcmask (!%p316_p9), 257027   ;;  %v393_v51 = vlaneseq (!%p316_p9)  ;;  %vm474_vm1 = vcmask (!%p316_p9), 257024  }
   0xf   : > { %319 = sbr.rel (%p316_p9) target bundleno = 6329 (0x18b9), region = 60  ;;  %v359_v2 = vld [vmem:[%s4652_s1] sm:$0xff] (!%p316_p9)  ;;  %v3610_v3 = vpack.c.bf16 (!%p316_p9), %v376_v1, %v375_v0  ;;  %v360_v4 = vld [vmem:[%s4652_s1 + $0x8] sm:$0xff] (!%p316_p9)  ;;  %v378_v6 = vld [vmem:[%s4652_s1 + $0x98] sm:$0xff] (!%p316_p9)  ;;  %vm478_vm2 = vcmask (!%p316_p9), 258048   ;;  %vm3897_vm3 = vmmov (!%p316_p9), 0  }
  0x10   : > { %v3612_v7 = vpack.c.bf16 (!%p316_p9), %v360_v4, %v359_v2  ;;  %v3614_v8 = vpack.c.bf16 (!%p316_p9), %v378_v6, %v377_v5  ;;  %v361_v9 = vld [vmem:[%s4652_s1 + $0x10] sm:$0xff] (!%p316_p9)  ;;  %v362_v10 = vld [vmem:[%s4652_s1 + $0x18] sm:$0xff] (!%p316_p9)  ;;  %v379_v11 = vld [vmem:[%s4652_s1 + $0xa0] sm:$0xff] (!%p316_p9)  ;;  %v4117_v52 = vshrl.u32 (!%p316_p9), %v393_v51, 7  ;;  %vm507_vm4 = vcmask (!%p316_p9), 261120   ;;  %s3899_s29 = smov (!%p316_p9), 120  }
  0x11   : > { %3611 = vmatprep.subr.bf16.mxu0 (!%p316_p9), %v3610_v3  ;;  %v380_v12 = vld [vmem:[%s4652_s1 + $0xa8] sm:$0xff] (!%p316_p9)  ;;  %v3616_v13 = vpack.c.bf16 (!%p316_p9), %v362_v10, %v361_v9  ;;  %v363_v15 = vld [vmem:[%s4652_s1 + $0x20] sm:$0xff] (!%p316_p9)  ;;  %v381_v17 = vld [vmem:[%s4652_s1 + $0xb0] sm:$0xff] (!%p316_p9)  ;;  %v3898_v10 = vmov (!%p316_p9), 0.0   ;;  %vm732_vm5 = vcmask (!%p316_p9), 64512   ;;  %s3900_s30 = smov (!%p316_p9), 104  }
  0x12   : > { %3613 = vmatpush3.bf16.msra.mxu0 (!%p316_p9), %v3612_v7  ;;  %v3618_v14 = vpack.c.bf16 (!%p316_p9), %v380_v12, %v379_v11  ;;  %v364_v16 = vld [vmem:[%s4652_s1 + $0x28] sm:$0xff] (!%p316_p9)  ;;  %v382_v18 = vld [vmem:[%s4652_s1 + $0xb8] sm:$0xff] (!%p316_p9)  ;;  %v365_v21 = vld [vmem:[%s4652_s1 + $0x30] sm:$0xff] (!%p316_p9)  ;;  %v4120_v53 = vsub.s32 (!%p316_p9), 0, %v4117_v52  ;;  %v3896_v7 = vmov (!%p316_p9), 0.0|0.0   ;;  %3379 = vmatprep.mubr.msk.f32.mxu1 (!%p316_p9), %vm3897_vm3, %v3898_v10  ;;  %vm826_vm6 = vcmask (!%p316_p9), 1044480  }
  0x13   : > { %3615 = vmatprep.subr.bf16.mxu0 (!%p316_p9), %v3614_v8  ;;  %v3620_v19 = vpack.c.bf16 (!%p316_p9), %v364_v16, %v363_v15  ;;  %v3622_v20 = vpack.c.bf16 (!%p316_p9), %v382_v18, %v381_v17  ;;  %v366_v22 = vld [vmem:[%s4652_s1 + $0x38] sm:$0xff] (!%p316_p9)  ;;  %v383_v23 = vld [vmem:[%s4652_s1 + $0xc0] sm:$0xff] (!%p316_p9)  ;;  %v384_v24 = vld [vmem:[%s4652_s1 + $0xc8] sm:$0xff] (!%p316_p9)  ;;  %3642 = vmatprep.subr.bf16.mxu1 (!%p316_p9), %v3896_v7  ;;  %v500_v16 = vsub.s32 (!%p316_p9), 1, %v4117_v52  ;;  %vm809_vm7 = vcmask (!%p316_p9), 36864   ;;  %s3901_s11 = smov (!%p316_p9), 112  }
  0x14   : > { %v3624_v27 = vpack.c.bf16 (!%p316_p9), %v366_v22, %v365_v21  ;;  %v3626_v28 = vpack.c.bf16 (!%p316_p9), %v384_v24, %v383_v23  ;;  %v367_v29 = vld [vmem:[%s4652_s1 + $0x40] sm:$0xff] (!%p316_p9)  ;;  %v368_v30 = vld [vmem:[%s4652_s1 + $0x48] sm:$0xff] (!%p316_p9)  ;;  %v385_v31 = vld [vmem:[%s4652_s1 + $0xd0] sm:$0xff] (!%p316_p9)  ;;  %vm822_vm8 = vcmask (!%p316_p9), 39936   ;;  %vm900_vm9 = vcmask (!%p316_p9), 61440   ;;  %s4663_s18 = smov (!%p316_p9), 16  }
  0x15   : > { %v386_v32 = vld [vmem:[%s4652_s1 + $0xd8] sm:$0xff] (!%p316_p9)  ;;  %v3628_v33 = vpack.c.bf16 (!%p316_p9), %v368_v30, %v367_v29  ;;  %v369_v35 = vld [vmem:[%s4652_s1 + $0x50] sm:$0xff] (!%p316_p9)  ;;  %v387_v37 = vld [vmem:[%s4652_s1 + $0xe0] sm:$0xff] (!%p316_p9)  ;;  %vm1073_vm10 = vcmask (!%p316_p9), 127040   ;;  %vm1246_vm11 = vcmask (!%p316_p9), 192640   ;;  %vm1419_vm12 = vcmask (!%p316_p9), 258240  }
  0x16   : > { %s353_s12 = scalar_select %p352_p10, %s3983_s17, 1  ;;  %3617 = vmatpush3.bf16.msra.mxu0 %v3616_v13  ;;  %v3630_v34 = vpack.c.bf16 %v386_v32, %v385_v31  ;;  %v370_v36 = vld [vmem:[%s4652_s1 + $0x58] sm:$0xff]  ;;  %v388_v38 = vld [vmem:[%s4652_s1 + $0xe8] sm:$0xff]  ;;  %v371_v41 = vld [vmem:[%s4652_s1 + $0x60] sm:$0xff]  ;;  %vm1646_vm14 = vcmask 523264  }
  0x17   : > { %3619 = vmatprep.subr.bf16.mxu0 %v3618_v14  ;;  %v3632_v39 = vpack.c.bf16 %v370_v36, %v369_v35  ;;  %v3634_v40 = vpack.c.bf16 %v388_v38, %v387_v37  ;;  %v372_v42 = vld [vmem:[%s4652_s1 + $0x68] sm:$0xff]  ;;  %v389_v43 = vld [vmem:[%s4652_s1 + $0xf0] sm:$0xff]  ;;  %v390_v44 = vld [vmem:[%s4652_s1 + $0xf8] sm:$0xff]  ;;  %s350_s28 = sand.u32 1, %s3886_s14  }
  0x18   : > { %s3230_s21 = sshll.u32 %s353_s12, 3  ;;  %v3636_v45 = vpack.c.bf16 %v372_v42, %v371_v41  ;;  %v3638_v46 = vpack.c.bf16 %v390_v44, %v389_v43  ;;  %v373_v47 = vld [vmem:[%s4652_s1 + $0x70] sm:$0xff]  ;;  %v374_v48 = vld [vmem:[%s4652_s1 + $0x78] sm:$0xff]  ;;  %v4114_v50 = vld [vmem:[%s4653_s2] sm:$0xff]  ;;  %s3069_s25 = scalar_lea.sflag [#allocation5], %s350_s28 }
  0x19   : > { %s356_s22 = scalar_lea.vmem %s4651_s0, %s3230_s21  ;;  %v3640_v49 = vpack.c.bf16 %v374_v48, %v373_v47  ;;  %392 = vst.msk [vmem:[#allocation2 - $0x3] sm:$0x8] %vm391_vm0, %v4114_v50  ;;  %v396_v55 = vrot.slane %v4114_v50, %v4120_v53  ;;  %v471_v58 = vrot.slane %v4114_v50, 4  ;;  %v503_v4 = vld [vmem:[%s4656_s5] sm:$0xff]  ;;  %v504_v5 = vld [vmem:[%s4656_s5 + $0x8] sm:$0xff]  ;;  %v505_v6 = vld [vmem:[%s4656_s5 + $0x10] sm:$0xff] }
  0x1a   : > { %v358_v25 = vld [vmem:[%s356_s22] sm:$0xff]  ;;  %3621 = vmatpush3.bf16.msra.mxu0 %v3620_v19  ;;  %v3643_v8 = vpack.c.bf16 %v504_v5, %v503_v4  ;;  %v506_v9 = vld [vmem:[%s4656_s5 + $0x18] sm:$0xff]  ;;  %v3144_v22 = vld [vmem:[%s4656_s5 + $0x28] sm:$0xff]  ;;  %s4664_s22 = smov 8   ;;  %s4662_s21 = smov 24   ;;  %vm2974_vm0 = vcmask 253952  }
  0x1b   : > { %v398_v26 = vcombine.high %v358_v25, %v358_v25  ;;  %3623 = vmatprep.subr.bf16.mxu0 %v3622_v20  ;;  %v3646_v11 = vpack.c.bf16 %v506_v9, %v505_v6  ;;  %v4154_v15 = vld [vmem:[%s4654_s3] sm:$0xff]  ;;  %v3149_v30 = vld [vmem:[%s4656_s5 + $0x48] sm:$0xff]  ;;  %v3150_v32 = vld [vmem:[%s4656_s5 + $0x50] sm:$0xff] }
  0x1c   : > { %3644 = vmatpush3.bf16.msra.mxu1 %v3643_v8  ;;  %v496_v17 = vrot.slane %v4154_v15, %v4120_v53  ;;  %v501_v20 = vrot.slane %v4154_v15, %v500_v16  ;;  %v3143_v21 = vld [vmem:[%s4656_s5 + $0x20] sm:$0xff] }
  0x1d   : > { %464 = vmatprep.mubr.f32.mxu0 %v398_v26  ;;  %3645 = vmatprep.subr.bf16.mxu1 %v3896_v7  ;;  %v3649_v24 = vpack.c.bf16 %v3144_v22, %v3143_v21  ;;  %v3145_v26 = vld [vmem:[%s4656_s5 + $0x30] sm:$0xff]  ;;  %v3148_v29 = vld [vmem:[%s4656_s5 + $0x40] sm:$0xff] }
  0x1e   : > { %3625 = vmatpush3.bf16.msra.mxu0 %v3624_v27  ;;  %v3146_v27 = vld [vmem:[%s4656_s5 + $0x38] sm:$0xff]  ;;  %v3655_v31 = vpack.c.bf16 %v3149_v30, %v3148_v29 }
  0x1f   : > { %3627 = vmatprep.subr.bf16.mxu0 %v3626_v28  ;;  %v3652_v28 = vpack.c.bf16 %v3146_v27, %v3145_v26 }
  0x20   : > { %3647 = vmatpush3.bf16.msra.mxu1 %v3646_v11 }
  0x21   : > { %3648 = vmatprep.subr.bf16.mxu1 %v3896_v7 }
  0x22   : > { %3629 = vmatpush3.bf16.msra.mxu0 %v3628_v33  ;;  %v3151_v33 = vld [vmem:[%s4656_s5 + $0x58] sm:$0xff] }
  0x23   : > { %3631 = vmatprep.subr.bf16.mxu0 %v3630_v34  ;;  %v3658_v34 = vpack.c.bf16 %v3151_v33, %v3150_v32 }
  0x26   : > { %3633 = vmatpush3.bf16.msra.mxu0 %v3632_v39 }
  0x27   : > { %3635 = vmatprep.subr.bf16.mxu0 %v3634_v40 }
  0x2a   : > { %3637 = vmatpush3.bf16.msra.mxu0 %v3636_v45 }
  0x2b   : > { %3639 = vmatprep.subr.bf16.mxu0 %v3638_v46 }
  0x2e   : > { %3641 = vmatpush3.bf16.msra.mxu0 %v3640_v49 }
  0x2f   : > { %3424 = vmatprep.subr.mxu0 %v3898_v10 }
  0x31   : > { %465 = vmatmul.mubr.f32.vlgmr.msra.gmra.mrb[0].mxu0 %v358_v25 }
  0x32   : > { %3426 = vmatprep.mubr.msk.f32.mxu0 %vm3897_vm3, %v3898_v10 }
 0x104   : > { %v3263_v54 = vpop.f32.mrb[0].mxu0 }
 0x105   : > { %v3264_v56 = vpop.f32.mrb[1].mxu0 }
 0x106   : > { %v3265_v57 = vadd.f32 %v3264_v56, %v3263_v54 }
 0x108   : > { %v467_v59 = vadd.f32 %v3265_v57, %v396_v55 }
 0x10a   : > { %v473_v60 = vadd.f32 %v471_v58, %v467_v59 }
 0x10c   : > { %475 = vst.msk [vmem:[#allocation2 + $0x1] sm:$0xf] %vm474_vm1, %v473_v60 }
 0x113   : > { %v4125_v61 = vld [vmem:[#allocation2] sm:$0x1f] }
 0x114   : > { %v479_v62 = vsel %vm478_vm2, %v4125_v61, 0.0 }
 0x115   : > { %480 = vadd.xlane.f32.xlu0 %v479_v62 }
 0x1a2   : > { %v481_v63 = vpop.xlane.xlu0 %480 }
 0x1a3   : > { %v483_v0 = vmul.f32 0.03125, %v481_v63 }
 0x1a5   : > { %v484_v1 = vsub.f32 %v4125_v61, %v483_v0 }
 0x1a7   : > { %v485_v2 = vmul.f32 %v484_v1, %v484_v1 }
 0x1a9   : > { %v486_v3 = vsel %vm478_vm2, %v485_v2, 0.0 }
 0x1aa   : > { %487 = vadd.xlane.f32.xlu0 %v486_v3 }
 0x237   : > { %v488_v12 = vpop.xlane.xlu0 %487 }
 0x238   : > { %v489_v13 = vmul.f32 0.03125, %v488_v12 }
 0x23a   : > { %v490_v14 = vadd.f32 1e-05, %v489_v13 }
 0x23c   : > { %3782 = vrsqrt.f32 %v490_v14 }
 0x246   : > { %v3783_v18 = vpop.eup %3782 }
 0x247   : > { %v492_v19 = vmul.f32 %v3783_v18, %v484_v1 }
 0x249   : > { %v497_v23 = vmul.f32 %v496_v17, %v492_v19 }
 0x24b   : > { %v502_v25 = vadd.f32 %v501_v20, %v497_v23 }
 0x24d   : > { %3380 = vmatmul.mubr.msk.f32.vlgmr.msra.gmra.mrb[0].mxu1 %vm507_vm4, %v502_v25 }
 0x24e   : > { %3650 = vmatpush3.bf16.msra.mxu1 %v3649_v24  ;;  %3390 = vmatprep.mubr.msk.f32.mxu1 %vm3897_vm3, %v3898_v10 }
 0x24f   : > { %3651 = vmatprep.subr.bf16.mxu1 %v3896_v7 }
 0x252   : > { %3653 = vmatpush3.bf16.msra.mxu1 %v3652_v28 }
 0x253   : > { %3654 = vmatprep.subr.bf16.mxu1 %v3896_v7 }
 0x255   : > { %3391 = vmatmul.mubr.msk.f32.vlgmr.msra.gmra.mrb[2].mxu1 %vm507_vm4, %v502_v25 }
 0x256   : > { %3656 = vmatpush3.bf16.msra.mxu1 %v3655_v31  ;;  %3401 = vmatprep.mubr.msk.f32.mxu1 %vm3897_vm3, %v3898_v10 }
 0x257   : > { %3657 = vmatprep.subr.bf16.mxu1 %v3896_v7 }
 0x25a   : > { %3659 = vmatpush3.bf16.msra.mxu1 %v3658_v34 }
 0x25b   : > { %3404 = vmatprep.subr.mxu1 %v3898_v10 }
 0x25d   : > { %3402 = vmatmul.mubr.msk.f32.vlgmr.msra.gmra.mrb[4].mxu1 %vm507_vm4, %v502_v25 }
 0x25e   : > { %3406 = vmatprep.mubr.msk.f32.mxu1 %vm3897_vm3, %v3898_v10 }
 0x320   : > { %v577_v35 = vpop.f32.mrb[0].mxu1 }
 0x321   : > { %v3381_v36 = vpop.f32.mrb[1].mxu1  ;;  %v581_v39 = vmul.f32 0.35355338, %v577_v35 }
 0x328   : > { %v653_v37 = vpop.f32.mrb[2].mxu1 }
 0x329   : > { %904 = vrot.lane.b32.xlu0 %v653_v37, %s3899_s29  ;;  %v3392_v38 = vpop.f32.mrb[3].mxu1  ;;  %3405 = vmatpush3.xpose.msk.msra.mxu1 %vm732_vm5, %v653_v37 }
 0x32a   : > { %3409 = vmatprep.subr.mxu1 %v3898_v10 }
 0x32c   : > { %3407 = vmatmul.mubr.msk.f32.vlgmr.msra.gmra.mrb[6].mxu1 %vm732_vm5, %v581_v39 }
 0x32d   : > { %1250 = vrot.lane.b32.xlu0 %v653_v37, %s3900_s30  ;;  %3411 = vmatprep.mubr.msk.f32.mxu1 %vm3897_vm3, %v3898_v10 }
 0x330   : > { %v4206_v40 = vpop.f32.mrb[4].mxu1 }
 0x331   : > { %v3403_v41 = vpop.f32.mrb[5].mxu1  ;;  %3410 = vmatpush3.msk.msra.mxu1 %vm826_vm6, %v4206_v40 }
 0x332   : > { %3414 = vmatprep.subr.mxu1 %v3898_v10  ;;  %v1422_v41 = vld [vmem:[%s4657_s6] sm:$0xff] }
 0x39b   : > { %v905_v55 = vpop.permute.xlu0 %904 }
 0x39f   : > { %v1251_v58 = vpop.permute.xlu0 %1250 }
 0x3ff   : > { %v805_v42 = vpop.f32.mrb[6].mxu1 }
 0x400   : > { %v3408_v43 = vpop.f32.mrb[7].mxu1  ;;  %v810_v44 = vsel %vm809_vm7, %v805_v42, -inf }
 0x401   : > { %811 = vmax.xlane.f32.xlu1 %v810_v44  ;;  %v1424_v44 = vld [vmem:[%s4657_s6 + $0x10] sm:$0xff] }
 0x412   : > { %902 = vrot.lane.b32.xlu1 %v581_v39, %s3899_s29 }
 0x416   : > { %1077 = vrot.lane.b32.xlu1 %v653_v37, %s3901_s11 }
 0x48e   : > { %v812_v45 = vpop.xlane.xlu1 %811 }
 0x48f   : > { %v813_v46 = vsub.f32 %v805_v42, %v812_v45  ;;  %v1423_v42 = vld [vmem:[%s4657_s6 + $0x8] sm:$0xff]  ;;  %v1425_v45 = vld [vmem:[%s4657_s6 + $0x18] sm:$0xff] }
 0x490   : > { %v3661_v43 = vpack.c.bf16 %v1423_v42, %v1422_v41  ;;  %v3170_v41 = vld [vmem:[%s4655_s4] ss:$0 sm:$0xff] }
 0x491   : > { %v814_v47 = vmul.f32 1.442695, %v813_v46  ;;  %v3664_v46 = vpack.c.bf16 %v1425_v45, %v1424_v44 }
 0x492   : > { %v903_v48 = vpop.permute.xlu1 %902 }
 0x493   : > { %3784 = vpow2.f32 %v814_v47 }
 0x496   : > { %v1078_v49 = vpop.permute.xlu1 %1077 }
 0x497   : > { %3425 = vmatpush3.xpose.msk.msra.mxu0 %vm732_vm5, %v1078_v49 }
 0x498   : > { %3434 = vmatprep.subr.mxu0 %v3898_v10 }
 0x49d   : > { %v3785_v51 = vpop.eup %3784 }
 0x49e   : > { %v816_v54 = vsel %vm809_vm7, %v3785_v51, 0.0 }
 0x49f   : > { %817 = vadd.xlane.f32.xlu1 %v816_v54 }
 0x4b0   : > { %1075 = vrot.lane.b32.xlu1 %v581_v39, %s3901_s11 }
 0x4b4   : > { %1248 = vrot.lane.b32.xlu1 %v581_v39, %s3900_s30 }
 0x52c   : > { %v818_v56 = vpop.xlane.xlu1 %817 }
 0x52d   : > { %3786 = vrcp.f32 %v818_v56 }
 0x530   : > { %v1076_v57 = vpop.permute.xlu1 %1075 }
 0x531   : > { %3427 = vmatmul.mubr.msk.f32.vlgmr.msra.gmra.mrb[2].mxu0 %vm732_vm5, %v1076_v57 }
 0x532   : > { %3435 = vmatpush3.xpose.msk.msra.mxu0 %vm732_vm5, %v1251_v58  ;;  %3436 = vmatprep.mubr.msk.f32.mxu0 %vm3897_vm3, %v3898_v10 }
 0x533   : > { %3660 = vmatprep.subr.bf16.mxu0 %v3896_v7 }
 0x534   : > { %v1249_v59 = vpop.permute.xlu1 %1248 }
 0x535   : > { %3437 = vmatmul.mubr.msk.f32.vlgmr.msra.gmra.mrb[4].mxu0 %vm732_vm5, %v1249_v59 }
 0x536   : > { %3452 = vmatprep.mubr.msk.f32.mxu0 %vm3897_vm3, %v3898_v10  ;;  %3662 = vmatpush3.bf16.msra.mxu0 %v3661_v43 }
 0x537   : > { %v3787_v60 = vpop.eup %3786  ;;  %3663 = vmatprep.subr.bf16.mxu0 %v3896_v7 }
 0x538   : > { %v821_v62 = vmul.f32 %v3787_v60, %v3785_v51  ;;  %v1428_v60 = vsub.s32 2, %v4117_v52 }
 0x53a   : > { %3412 = vmatmul.mubr.msk.f32.vlgmr.msra.gmra.mrb[8].mxu1 %vm822_vm8, %v821_v62  ;;  %3665 = vmatpush3.bf16.msra.mxu0 %v3664_v46  ;;  %v1429_v62 = vrot.slane %v4154_v15, %v1428_v60 }
 0x53b   : > { %3415 = vmatpush3.xpose.msk.msra.mxu1 %vm732_vm5, %v905_v55  ;;  %3416 = vmatprep.mubr.msk.f32.mxu1 %vm3897_vm3, %v3898_v10 }
 0x53c   : > { %3419 = vmatprep.subr.mxu1 %v3898_v10  ;;  %3672 = vmatprep.subr.bf16.mxu0 %v3896_v7 }
 0x53e   : > { %3417 = vmatmul.mubr.msk.f32.vlgmr.msra.gmra.mrb[10].mxu1 %vm732_vm5, %v903_v48 }
 0x53f   : > { %3421 = vmatprep.mubr.msk.f32.mxu1 %vm3897_vm3, %v3898_v10 }
 0x604   : > { %v1149_v63 = vpop.f32.mrb[2].mxu0 }
 0x605   : > { %v3428_v0 = vpop.f32.mrb[3].mxu0  ;;  %v1153_v1 = vsel %vm809_vm7, %v1149_v63, -inf }
 0x606   : > { %1154 = vmax.xlane.f32.xlu1 %v1153_v1 }
 0x608   : > { %v1322_v2 = vpop.f32.mrb[4].mxu0 }
 0x609   : > { %v3438_v3 = vpop.f32.mrb[5].mxu0  ;;  %v1326_v11 = vsel %vm809_vm7, %v1322_v2, -inf }
 0x60d   : > { %v896_v4 = vpop.f32.mrb[8].mxu1 }
 0x60e   : > { %901 = vst.msk [vmem:[#allocation3] sm:$0x1f] %vm900_vm9, %v896_v4  ;;  %v3413_v5 = vpop.f32.mrb[9].mxu1 }
 0x611   : > { %v976_v6 = vpop.f32.mrb[10].mxu1 }
 0x612   : > { %v3418_v8 = vpop.f32.mrb[11].mxu1  ;;  %v980_v9 = vsel %vm809_vm7, %v976_v6, -inf }
 0x613   : > { %981 = vmax.xlane.f32.xlu0 %v980_v9 }
 0x617   : > { %1327 = vmax.xlane.f32.xlu0 %v1326_v11  ;;  %v1527_v11 = vld [vmem:[%s4658_s7] sm:$0xff] }
 0x693   : > { %v1155_v12 = vpop.xlane.xlu1 %1154 }
 0x694   : > { %v1156_v13 = vsub.f32 %v1149_v63, %v1155_v12 }
 0x696   : > { %v1157_v14 = vmul.f32 1.442695, %v1156_v13  ;;  %v1529_v13 = vld [vmem:[%s4658_s7 + $0x10] sm:$0xff] }
 0x698   : > { %3788 = vpow2.f32 %v1157_v14  ;;  %v1530_v14 = vld [vmem:[%s4658_s7 + $0x18] sm:$0xff] }
 0x6a0   : > { %v982_v17 = vpop.xlane.xlu0 %981 }
 0x6a1   : > { %v983_v18 = vsub.f32 %v976_v6, %v982_v17  ;;  %v3670_v17 = vpack.c.bf16 %v1530_v14, %v1529_v13  ;;  %v1723_v14 = vsub.s32 5, %v4117_v52 }
 0x6a2   : > { %v3789_v19 = vpop.eup %3788 }
 0x6a3   : > { %v984_v20 = vmul.f32 1.442695, %v983_v18  ;;  %v1159_v21 = vsel %vm809_vm7, %v3789_v19, 0.0 }
 0x6a4   : > { %1160 = vadd.xlane.f32.xlu0 %v1159_v21  ;;  %v1328_v22 = vpop.xlane.xlu0 %1327  ;;  %v1519_v21 = vsub.s32 3, %v4117_v52 }
 0x6a5   : > { %3790 = vpow2.f32 %v984_v20  ;;  %v1329_v23 = vsub.f32 %v1322_v2, %v1328_v22  ;;  %v1524_v22 = vsub.s32 4, %v4117_v52  ;;  %v2969_v52 = vld [vmem:[%s4660_s9] sm:$0xff] }
 0x6a7   : > { %v1330_v24 = vmul.f32 1.442695, %v1329_v23  ;;  %v1520_v23 = vrot.slane %v4154_v15, %v1519_v21 }
 0x6a9   : > { %3792 = vpow2.f32 %v1330_v24 }
 0x6af   : > { %v3791_v25 = vpop.eup %3790 }
 0x6b0   : > { %v986_v26 = vsel %vm809_vm7, %v3791_v25, 0.0 }
 0x6b1   : > { %987 = vadd.xlane.f32.xlu0 %v986_v26  ;;  %v1525_v26 = vrot.slane %v4154_v15, %v1524_v22 }
 0x6b3   : > { %v3793_v27 = vpop.eup %3792 }
 0x6b4   : > { %v1332_v28 = vsel %vm809_vm7, %v3793_v27, 0.0 }
 0x6b5   : > { %1333 = vadd.xlane.f32.xlu1 %v1332_v28 }
 0x6c6   : > { %1165 = vrot.lane.b32.xlu1 %v4206_v40, %s3901_s11 }
 0x6c7   : > { %992 = vrot.lane.b32.xlu0 %v4206_v40, %s3899_s29 }
 0x6ca   : > { %1338 = vrot.lane.b32.xlu1 %v4206_v40, %s3900_s30 }
 0x731   : > { %v1161_v29 = vpop.xlane.xlu0 %1160 }
 0x73e   : > { %v988_v30 = vpop.xlane.xlu0 %987 }
 0x73f   : > { %3794 = vrcp.f32 %v988_v30  ;;  %v1639_v30 = vld [vmem:[%s4659_s8 + $0x8] sm:$0xff] }
 0x740   : > { %3796 = vrcp.f32 %v1161_v29  ;;  %v1638_v29 = vld [vmem:[%s4659_s8] sm:$0xff] }
 0x742   : > { %v1334_v31 = vpop.xlane.xlu1 %1333  ;;  %v993_v32 = vpop.permute.xlu0 %992 }
 0x743   : > { %3420 = vmatpush3.msk.msra.mxu1 %vm826_vm6, %v993_v32  ;;  %3798 = vrcp.f32 %v1334_v31  ;;  %v3673_v31 = vpack.c.bf16 %v1639_v30, %v1638_v29  ;;  %v1640_v32 = vld [vmem:[%s4659_s8 + $0x10] sm:$0xff] }
 0x744   : > { %3429 = vmatprep.subr.mxu1 %v3898_v10 }
 0x746   : > { %v1166_v35 = vpop.permute.xlu1 %1165 }
 0x749   : > { %v3795_v33 = vpop.eup %3794 }
 0x74a   : > { %v991_v34 = vmul.f32 %v3795_v33, %v3791_v25  ;;  %v3797_v36 = vpop.eup %3796  ;;  %v1339_v39 = vpop.permute.xlu1 %1338  ;;  %v1641_v33 = vld [vmem:[%s4659_s8 + $0x18] sm:$0xff] }
 0x74b   : > { %v1164_v37 = vmul.f32 %v3797_v36, %v3789_v19  ;;  %v1643_v36 = vld [vmem:[%s4659_s8 + $0x28] sm:$0xff] }
 0x74c   : > { %3422 = vmatmul.mubr.msk.f32.vlgmr.msra.gmra.mrb[12].mxu1 %vm822_vm8, %v991_v34  ;;  %v3676_v34 = vpack.c.bf16 %v1641_v33, %v1640_v32  ;;  %v3185_v32 = vld [vmem:[%s4656_s5 + $0xa8] sm:$0xff] }
 0x74d   : > { %3430 = vmatpush3.msk.msra.mxu1 %vm826_vm6, %v1166_v35  ;;  %3431 = vmatprep.mubr.msk.f32.mxu1 %vm3897_vm3, %v3898_v10  ;;  %v3799_v38 = vpop.eup %3798  ;;  %v1642_v35 = vld [vmem:[%s4659_s8 + $0x20] sm:$0xff] }
 0x74e   : > { %3439 = vmatprep.subr.mxu1 %v3898_v10  ;;  %v1337_v40 = vmul.f32 %v3799_v38, %v3793_v27  ;;  %v1644_v38 = vld [vmem:[%s4659_s8 + $0x30] sm:$0xff] }
 0x750   : > { %3432 = vmatmul.mubr.msk.f32.vlgmr.msra.gmra.mrb[14].mxu1 %vm822_vm8, %v1164_v37  ;;  %v3679_v37 = vpack.c.bf16 %v1643_v36, %v1642_v35  ;;  %v3177_v35 = vld [vmem:[%s4656_s5 + $0x78] sm:$0xff]  ;;  %v3186_v36 = vld [vmem:[%s4656_s5 + $0xb0] sm:$0xff] }
 0x751   : > { %3440 = vmatpush3.msk.msra.mxu1 %vm826_vm6, %v1339_v39  ;;  %3441 = vmatprep.mubr.msk.f32.mxu1 %vm3897_vm3, %v3898_v10  ;;  %v1645_v39 = vld [vmem:[%s4659_s8 + $0x38] sm:$0xff] }
 0x752   : > { %3666 = vmatprep.subr.bf16.mxu1 %v3896_v7 }
 0x754   : > { %3442 = vmatmul.mubr.msk.f32.vlgmr.msra.gmra.mrb[16].mxu1 %vm822_vm8, %v1337_v40  ;;  %v3682_v40 = vpack.c.bf16 %v1645_v39, %v1644_v38  ;;  %v3187_v38 = vld [vmem:[%s4656_s5 + $0xb8] sm:$0xff] }
 0x755   : > { %3463 = vmatprep.mubr.msk.f32.mxu1 %vm3897_vm3, %v3898_v10  ;;  %v3700_v39 = vpack.c.bf16 %v3187_v38, %v3186_v36 }
 0x81f   : > { %v1065_v47 = vpop.f32.mrb[12].mxu1 }
 0x820   : > { %1070 = vrot.lane.b32.xlu1 %v1065_v47, %s4664_s22  ;;  %v3423_v48 = vpop.f32.mrb[13].mxu1 }
 0x823   : > { %v1238_v49 = vpop.f32.mrb[14].mxu1 }
 0x824   : > { %1243 = vrot.lane.b32.xlu0 %v1238_v49, %s4663_s18  ;;  %v3433_v51 = vpop.f32.mrb[15].mxu1  ;;  %s4670_s18 = smov 24  }
 0x827   : > { %v1411_v54 = vpop.f32.mrb[16].mxu1 }
 0x828   : > { %1416 = vrot.lane.b32.xlu1 %v1411_v54, %s4662_s21  ;;  %v3443_v55 = vpop.f32.mrb[17].mxu1 }
 0x892   : > { %v1071_v56 = vpop.permute.xlu1 %1070 }
 0x893   : > { %1074 = vst.msk [vmem:[#allocation3] sm:$0x1f] %vm1073_vm10, %v1071_v56 }
 0x896   : > { %v1244_v57 = vpop.permute.xlu0 %1243 }
 0x897   : > { %1247 = vst.msk [vmem:[#allocation3] sm:$0x1f] %vm1246_vm11, %v1244_v57 }
 0x89a   : > { %v1417_v58 = vpop.permute.xlu1 %1416 }
 0x89b   : > { %1420 = vst.msk [vmem:[#allocation3] sm:$0x1f] %vm1419_vm12, %v1417_v58 }
 0x8a2   : > { %v1421_v59 = vld [vmem:[#allocation3] sm:$0x1f] }
 0x8a3   : > { %3453 = vmatmul.mubr.msk.f32.vlgmr.msra.gmra.mrb[6].mxu0 %vm507_vm4, %v1421_v59 }
 0x8a4   : > { %3482 = vmatprep.mubr.msk.f32.mxu0 %vm3897_vm3, %v3898_v10  ;;  %3674 = vmatpush3.bf16.msra.mxu0 %v3673_v31  ;;  %v3184_v31 = vld [vmem:[%s4656_s5 + $0xa0] sm:$0xff] }
 0x8a5   : > { %3675 = vmatprep.subr.bf16.mxu0 %v3896_v7  ;;  %v3697_v33 = vpack.c.bf16 %v3185_v32, %v3184_v31 }
 0x8a8   : > { %3677 = vmatpush3.bf16.msra.mxu0 %v3676_v34  ;;  %v3176_v34 = vld [vmem:[%s4656_s5 + $0x70] sm:$0xff] }
 0x8a9   : > { %3678 = vmatprep.subr.bf16.mxu0 %v3896_v7 }
 0x8ac   : > { %3680 = vmatpush3.bf16.msra.mxu0 %v3679_v37  ;;  %v3688_v37 = vpack.c.bf16 %v3177_v35, %v3176_v34 }
 0x8ad   : > { %3681 = vmatprep.subr.bf16.mxu0 %v3896_v7 }
 0x8b0   : > { %3683 = vmatpush3.bf16.msra.mxu0 %v3682_v40 }
 0x8b1   : > { %3696 = vmatprep.subr.bf16.mxu0 %v3896_v7 }
 0x976   : > { %v1499_v63 = vpop.f32.mrb[6].mxu0 }
 0x977   : > { %v1500_v0 = vadd.f32 %v1499_v63, %v1429_v62  ;;  %v3454_v1 = vpop.f32.mrb[7].mxu0 }
 0x979   : > { %v4291_v2 = vadd.f32 %v1500_v0, %v4125_v61  ;;  %v1528_v61 = vld [vmem:[%s4658_s7 + $0x8] sm:$0xff] }
 0x97a   : > { %v3667_v12 = vpack.c.bf16 %v1528_v61, %v1527_v11 }
 0x97b   : > { %v1504_v3 = vsel %vm478_vm2, %v4291_v2, 0.0 }
 0x97c   : > { %1505 = vadd.xlane.f32.xlu0 %v1504_v3  ;;  %3668 = vmatpush3.bf16.msra.mxu1 %v3667_v12 }
 0x97d   : > { %3669 = vmatprep.subr.bf16.mxu1 %v3896_v7 }
 0x980   : > { %3671 = vmatpush3.bf16.msra.mxu1 %v3670_v17  ;;  %v1724_v17 = vrot.slane %v4154_v15, %v1723_v14  ;;  %v3174_v15 = vld [vmem:[%s4656_s5 + $0x60] sm:$0xff] }
 0x981   : > { %3684 = vmatprep.subr.bf16.mxu1 %v3896_v7 }
 0xa09   : > { %v1506_v4 = vpop.xlane.xlu0 %1505 }
 0xa0a   : > { %v1507_v5 = vmul.f32 0.03125, %v1506_v4 }
 0xa0c   : > { %v1508_v6 = vsub.f32 %v4291_v2, %v1507_v5 }
 0xa0e   : > { %v1509_v8 = vmul.f32 %v1508_v6, %v1508_v6 }
 0xa10   : > { %v1510_v9 = vsel %vm478_vm2, %v1509_v8, 0.0  ;;  %v3905_v8 = vmov -1.0  }
 0xa11   : > { %1511 = vadd.xlane.f32.xlu1 %v1510_v9 }
 0xa9e   : > { %v1512_v18 = vpop.xlane.xlu1 %1511 }
 0xa9f   : > { %v1513_v19 = vmul.f32 0.03125, %v1512_v18 }
 0xaa1   : > { %v1514_v20 = vadd.f32 1e-05, %v1513_v19 }
 0xaa3   : > { %3800 = vrsqrt.f32 %v1514_v20 }
 0xaad   : > { %v3801_v24 = vpop.eup %3800 }
 0xaae   : > { %v1516_v25 = vmul.f32 %v3801_v24, %v1508_v6 }
 0xab0   : > { %v1521_v27 = vmul.f32 %v1520_v23, %v1516_v25 }
 0xab2   : > { %v1526_v28 = vadd.f32 %v1525_v26, %v1521_v27 }
 0xab4   : > { %3464 = vmatmul.mubr.msk.f32.vlgmr.msra.gmra.mrb[18].mxu1 %vm507_vm4, %v1526_v28 }
 0xab5   : > { %3493 = vmatprep.mubr.msk.f32.mxu1 %vm3897_vm3, %v3898_v10 }
 0xb87   : > { %v1607_v42 = vpop.f32.mrb[18].mxu1 }
 0xb88   : > { %v1608_v43 = vadd.f32 %v3170_v41, %v1607_v42  ;;  %v3465_v44 = vpop.f32.mrb[19].mxu1 }
 0xb8a   : > { %v1612_v45 = vmul.f32 0.70710677, %v1608_v43  ;;  %v1611_v61 = vmul.f32 0.5, %v1608_v43  ;;  %v4399_v43 = vld [vmem:[%s4654_s3 + $0x8] sm:$0xff] }
 0xb8b   : > { %v1744_v44 = vrot.slane %v4399_v43, %v4120_v53  ;;  %v3181_v53 = vld [vmem:[%s4656_s5 + $0x90] sm:$0xff] }
 0xb8c   : > { %v1615_v46 = vand.u32 2147483647, %v1612_v45  ;;  %vm1613_vm13 = vcmp.ge.f32.partialorder %v1612_v45, 0.0 }
 0xb8d   : > { %v1614_v9 = vsel %vm1613_vm13, 1.0, %v3905_v8 }
 0xb8e   : > { %v1616_v47 = vmul.f32 0.3275911, %v1615_v46  ;;  %v1629_v49 = vsub.f32 0.0, %v1615_v46 }
 0xb90   : > { %v1617_v48 = vadd.f32 1.0, %v1616_v47  ;;  %v1630_v54 = vmul.f32 %v1629_v49, %v1615_v46  ;;  %v1749_v46 = vrot.slane %v4399_v43, %v500_v16  ;;  %v3180_v49 = vld [vmem:[%s4656_s5 + $0x88] sm:$0xff]  ;;  %v3182_v16 = vld [vmem:[%s4656_s5 + $0x98] sm:$0xff] }
 0xb92   : > { %3802 = vrcp.f32 %v1617_v48  ;;  %v1631_v57 = vmul.f32 1.442695, %v1630_v54  ;;  %v3179_v48 = vld [vmem:[%s4656_s5 + $0x80] sm:$0xff] }
 0xb93   : > { %v3691_v54 = vpack.c.bf16 %v3180_v49, %v3179_v48 }
 0xb94   : > { %3804 = vpow2.f32 %v1631_v57 }
 0xb9c   : > { %v3803_v51 = vpop.eup %3802 }
 0xb9d   : > { %v1620_v55 = vmul.f32 1.0614054, %v3803_v51 }
 0xb9e   : > { %v3805_v4 = vpop.eup %3804 }
 0xb9f   : > { %v1621_v56 = vadd.f32 -1.4531521, %v1620_v55 }
 0xba1   : > { %v1622_v58 = vmul.f32 %v3803_v51, %v1621_v56  ;;  %v3694_v56 = vpack.c.bf16 %v3182_v16, %v3181_v53 }
 0xba3   : > { %v1623_v59 = vadd.f32 1.4214138, %v1622_v58 }
 0xba5   : > { %v1624_v62 = vmul.f32 %v3803_v51, %v1623_v59 }
 0xba7   : > { %v1625_v63 = vadd.f32 -0.28449672, %v1624_v62 }
 0xba9   : > { %v1626_v0 = vmul.f32 %v3803_v51, %v1625_v63 }
 0xbab   : > { %v1627_v1 = vadd.f32 0.2548296, %v1626_v0 }
 0xbad   : > { %v1628_v3 = vmul.f32 %v3803_v51, %v1627_v1 }
 0xbaf   : > { %v1633_v5 = vmul.f32 %v3805_v4, %v1628_v3 }
 0xbb1   : > { %v1634_v6 = vsub.f32 1.0, %v1633_v5 }
 0xbb3   : > { %v1635_v11 = vmul.f32 %v1634_v6, %v1614_v9 }
 0xbb5   : > { %v1636_v12 = vadd.f32 1.0, %v1635_v11 }
 0xbb7   : > { %v1637_v13 = vmul.f32 %v1636_v12, %v1611_v61 }
 0xbb9   : > { %3483 = vmatmul.mubr.msk.f32.vlgmr.msra.gmra.mrb[8].mxu0 %vm1646_vm14, %v1637_v13 }
 0xbba   : > { %3515 = vmatprep.mubr.msk.f32.mxu0 %vm3897_vm3, %v3898_v10  ;;  %3698 = vmatpush3.bf16.msra.mxu0 %v3697_v33 }
 0xbbb   : > { %3699 = vmatprep.subr.bf16.mxu0 %v3896_v7 }
 0xbbe   : > { %3701 = vmatpush3.bf16.msra.mxu0 %v3700_v39 }
 0xbbf   : > { %3528 = vmatprep.subr.mxu0 %v3898_v10 }
 0xc8c   : > { %v1716_v18 = vpop.f32.mrb[8].mxu0 }
 0xc8d   : > { %v1720_v19 = vadd.f32 %v1716_v18, %v4291_v2  ;;  %v3484_v20 = vpop.f32.mrb[9].mxu0  ;;  %v3175_v2 = vld [vmem:[%s4656_s5 + $0x68] sm:$0xff] }
 0xc8e   : > { %v3685_v30 = vpack.c.bf16 %v3175_v2, %v3174_v15 }
 0xc8f   : > { %v4362_v23 = vadd.f32 %v1724_v17, %v1720_v19 }
 0xc90   : > { %3686 = vmatpush3.bf16.msra.mxu1 %v3685_v30 }
 0xc91   : > { %v1728_v24 = vsel %vm478_vm2, %v4362_v23, 0.0  ;;  %3687 = vmatprep.subr.bf16.mxu1 %v3896_v7 }
 0xc92   : > { %1729 = vadd.xlane.f32.xlu0 %v1728_v24 }
 0xc94   : > { %3689 = vmatpush3.bf16.msra.mxu1 %v3688_v37 }
 0xc95   : > { %3690 = vmatprep.subr.bf16.mxu1 %v3896_v7 }
 0xd1f   : > { %v1730_v25 = vpop.xlane.xlu0 %1729 }
 0xd20   : > { %v1731_v26 = vmul.f32 0.03125, %v1730_v25 }
 0xd22   : > { %v1732_v27 = vsub.f32 %v4362_v23, %v1731_v26 }
 0xd24   : > { %v1733_v28 = vmul.f32 %v1732_v27, %v1732_v27 }
 0xd26   : > { %v1734_v29 = vsel %vm478_vm2, %v1733_v28, 0.0 }
 0xd27   : > { %1735 = vadd.xlane.f32.xlu0 %v1734_v29 }
 0xdb4   : > { %v1736_v40 = vpop.xlane.xlu0 %1735 }
 0xdb5   : > { %v1737_v41 = vmul.f32 0.03125, %v1736_v40 }
 0xdb7   : > { %v1738_v42 = vadd.f32 1e-05, %v1737_v41 }
 0xdb9   : > { %3806 = vrsqrt.f32 %v1738_v42 }
 0xdc3   : > { %v3807_v45 = vpop.eup %3806 }
 0xdc4   : > { %v1740_v47 = vmul.f32 %v3807_v45, %v1732_v27 }
 0xdc6   : > { %v1745_v51 = vmul.f32 %v1744_v44, %v1740_v47 }
 0xdc8   : > { %v1750_v55 = vadd.f32 %v1749_v46, %v1745_v51 }
 0xdca   : > { %3494 = vmatmul.mubr.msk.f32.vlgmr.msra.gmra.mrb[20].mxu1 %vm507_vm4, %v1750_v55  ;;  %3516 = vmatmul.mubr.msk.f32.vlgmr.msra.gmra.mrb[10].mxu0 %vm507_vm4, %v1750_v55 }
 0xdcb   : > { %3692 = vmatpush3.bf16.msra.mxu1 %v3691_v54  ;;  %3504 = vmatprep.mubr.msk.f32.mxu1 %vm3897_vm3, %v3898_v10 }
 0xdcc   : > { %3693 = vmatprep.subr.bf16.mxu1 %v3896_v7  ;;  %3530 = vmatprep.mubr.msk.f32.mxu0 %vm3897_vm3, %v3898_v10 }
 0xdcf   : > { %3695 = vmatpush3.bf16.msra.mxu1 %v3694_v56 }
 0xdd0   : > { %3518 = vmatprep.subr.mxu1 %v3898_v10 }
 0xdd2   : > { %3505 = vmatmul.mubr.msk.f32.vlgmr.msra.gmra.mrb[22].mxu1 %vm507_vm4, %v1750_v55 }
 0xdd3   : > { %3520 = vmatprep.mubr.msk.f32.mxu1 %vm3897_vm3, %v3898_v10 }
 0xe9d   : > { %v1825_v57 = vpop.f32.mrb[20].mxu1  ;;  %v4429_v58 = vpop.f32.mrb[10].mxu0 }
 0xe9e   : > { %v1829_v59 = vmul.f32 0.35355338, %v1825_v57  ;;  %v3495_v62 = vpop.f32.mrb[21].mxu1  ;;  %v3517_v63 = vpop.f32.mrb[11].mxu0 }
 0xea0   : > { %2145 = vrot.lane.b32.xlu1 %v1829_v59, %s3899_s29 }
 0xea5   : > { %v1901_v0 = vpop.f32.mrb[22].mxu1 }
 0xea6   : > { %2319 = vrot.lane.b32.xlu1 %v1901_v0, %s3901_s11  ;;  %2147 = vrot.lane.b32.xlu0 %v1901_v0, %s3899_s29  ;;  %v3506_v1 = vpop.f32.mrb[23].mxu1 }
 0xea7   : > { %3519 = vmatpush3.xpose.msk.msra.mxu1 %vm732_vm5, %v1901_v0 }
 0xea8   : > { %3523 = vmatprep.subr.mxu1 %v3898_v10 }
 0xeaa   : > { %3521 = vmatmul.mubr.msk.f32.vlgmr.msra.gmra.mrb[24].mxu1 %vm732_vm5, %v1829_v59  ;;  %2317 = vrot.lane.b32.xlu1 %v1829_v59, %s3901_s11 }
 0xeab   : > { %2491 = vrot.lane.b32.xlu0 %v1901_v0, %s3900_s30  ;;  %3524 = vmatpush3.msk.msra.mxu1 %vm826_vm6, %v4429_v58 }
 0xeac   : > { %3525 = vmatprep.mubr.msk.f32.mxu1 %vm3897_vm3, %v3898_v10  ;;  %3533 = vmatprep.subr.mxu1 %v3898_v10 }
 0xeae   : > { %2489 = vrot.lane.b32.xlu1 %v1829_v59, %s3900_s30 }
 0xf12   : > { %v2146_v3 = vpop.permute.xlu1 %2145 }
 0xf18   : > { %v2320_v4 = vpop.permute.xlu1 %2319  ;;  %v2148_v5 = vpop.permute.xlu0 %2147 }
 0xf19   : > { %3529 = vmatpush3.xpose.msk.msra.mxu0 %vm732_vm5, %v2148_v5 }
 0xf1a   : > { %3538 = vmatprep.subr.mxu0 %v3898_v10 }
 0xf1c   : > { %3531 = vmatmul.mubr.msk.f32.vlgmr.msra.gmra.mrb[12].mxu0 %vm732_vm5, %v2146_v3  ;;  %v2318_v6 = vpop.permute.xlu1 %2317 }
 0xf1d   : > { %3539 = vmatpush3.xpose.msk.msra.mxu0 %vm732_vm5, %v2320_v4  ;;  %3540 = vmatprep.mubr.msk.f32.mxu0 %vm3897_vm3, %v3898_v10  ;;  %v2492_v9 = vpop.permute.xlu0 %2491 }
 0xf1e   : > { %3548 = vmatprep.subr.mxu0 %v3898_v10 }
 0xf20   : > { %3541 = vmatmul.mubr.msk.f32.vlgmr.msra.gmra.mrb[14].mxu0 %vm732_vm5, %v2318_v6  ;;  %v2490_v11 = vpop.permute.xlu1 %2489 }
 0xf21   : > { %3549 = vmatpush3.xpose.msk.msra.mxu0 %vm732_vm5, %v2492_v9  ;;  %3550 = vmatprep.mubr.msk.f32.mxu0 %vm3897_vm3, %v3898_v10 }
 0xf22   : > { %3702 = vmatprep.subr.bf16.mxu0 %v3896_v7 }
 0xf24   : > { %3551 = vmatmul.mubr.msk.f32.vlgmr.msra.gmra.mrb[16].mxu0 %vm732_vm5, %v2490_v11 }
 0xf25   : > { %3566 = vmatprep.mubr.msk.f32.mxu0 %vm3897_vm3, %v3898_v10 }
 0xf7d   : > { %v2052_v61 = vpop.f32.mrb[24].mxu1 }
 0xf7e   : > { %v3522_v12 = vpop.f32.mrb[25].mxu1  ;;  %v2056_v13 = vsel %vm809_vm7, %v2052_v61, -inf }
 0xf7f   : > { %2057 = vmax.xlane.f32.xlu0 %v2056_v13  ;;  %v3206_v12 = vld [vmem:[%s4657_s6 + $0x28] sm:$0xff] }
 0xfef   : > { %v2219_v17 = vpop.f32.mrb[12].mxu0 }
 0xff0   : > { %v3532_v18 = vpop.f32.mrb[13].mxu0  ;;  %v2223_v19 = vsel %vm809_vm7, %v2219_v17, -inf }
 0xff1   : > { %2224 = vmax.xlane.f32.xlu1 %v2223_v19  ;;  %v3208_v18 = vld [vmem:[%s4657_s6 + $0x38] sm:$0xff] }
 0xff3   : > { %v2391_v20 = vpop.f32.mrb[14].mxu0 }
 0xff4   : > { %v3542_v24 = vpop.f32.mrb[15].mxu0  ;;  %v2395_v25 = vsel %vm809_vm7, %v2391_v20, -inf }
 0xff5   : > { %2396 = vmax.xlane.f32.xlu0 %v2395_v25 }
 0xff7   : > { %v2563_v26 = vpop.f32.mrb[16].mxu0 }
 0xff8   : > { %v3552_v27 = vpop.f32.mrb[17].mxu0  ;;  %v2567_v28 = vsel %vm809_vm7, %v2563_v26, -inf }
 0xff9   : > { %2568 = vmax.xlane.f32.xlu0 %v2567_v28 }
0x100c   : > { %v2058_v29 = vpop.xlane.xlu0 %2057 }
0x100d   : > { %v2059_v15 = vsub.f32 %v2052_v61, %v2058_v29  ;;  %v3205_v61 = vld [vmem:[%s4657_s6 + $0x20] sm:$0xff]  ;;  %v2670_v29 = vrot.slane %v4399_v43, %v1428_v60 }
0x100e   : > { %v3703_v13 = vpack.c.bf16 %v3206_v12, %v3205_v61  ;;  %v3210_v60 = vld [vmem:[%s4658_s7 + $0x20] sm:$0xff] }
0x100f   : > { %v2060_v2 = vmul.f32 1.442695, %v2059_v15 }
0x1010   : > { %3704 = vmatpush3.bf16.msra.mxu0 %v3703_v13 }
0x1011   : > { %3808 = vpow2.f32 %v2060_v2  ;;  %3705 = vmatprep.subr.bf16.mxu0 %v3896_v7 }
0x101b   : > { %v3809_v30 = vpop.eup %3808 }
0x101c   : > { %v2062_v31 = vsel %vm809_vm7, %v3809_v30, 0.0 }
0x101d   : > { %2063 = vadd.xlane.f32.xlu0 %v2062_v31 }
0x107e   : > { %v2225_v32 = vpop.xlane.xlu1 %2224 }
0x107f   : > { %v2226_v33 = vsub.f32 %v2219_v17, %v2225_v32  ;;  %v3207_v17 = vld [vmem:[%s4657_s6 + $0x30] sm:$0xff] }
0x1080   : > { %v3706_v19 = vpack.c.bf16 %v3208_v18, %v3207_v17 }
0x1081   : > { %v2227_v34 = vmul.f32 1.442695, %v2226_v33 }
0x1082   : > { %v2397_v35 = vpop.xlane.xlu0 %2396  ;;  %3707 = vmatpush3.bf16.msra.mxu0 %v3706_v19 }
0x1083   : > { %3810 = vpow2.f32 %v2227_v34  ;;  %v2398_v36 = vsub.f32 %v2391_v20, %v2397_v35  ;;  %3714 = vmatprep.subr.bf16.mxu0 %v3896_v7 }
0x1085   : > { %v2399_v37 = vmul.f32 1.442695, %v2398_v36 }
0x1086   : > { %v2569_v42 = vpop.xlane.xlu0 %2568 }
0x1087   : > { %3812 = vpow2.f32 %v2399_v37  ;;  %v2570_v45 = vsub.f32 %v2563_v26, %v2569_v42 }
0x1089   : > { %v2571_v46 = vmul.f32 1.442695, %v2570_v45 }
0x108d   : > { %v3811_v38 = vpop.eup %3810 }
0x108e   : > { %v2229_v39 = vsel %vm809_vm7, %v3811_v38, 0.0 }
0x108f   : > { %2230 = vadd.xlane.f32.xlu1 %v2229_v39  ;;  %v3212_v39 = vld [vmem:[%s4658_s7 + $0x30] sm:$0xff] }
0x1091   : > { %v3813_v40 = vpop.eup %3812 }
0x1092   : > { %v2401_v41 = vsel %vm809_vm7, %v3813_v40, 0.0 }
0x1093   : > { %2402 = vadd.xlane.f32.xlu0 %v2401_v41 }
0x10a0   : > { %2407 = vrot.lane.b32.xlu1 %v4429_v58, %s3901_s11 }
0x10a9   : > { %2235 = vrot.lane.b32.xlu0 %v4429_v58, %s3899_s29  ;;  %s4668_s29 = smov 8  }
0x10aa   : > { %v2064_v44 = vpop.xlane.xlu0 %2063 }
0x10ab   : > { %3814 = vrcp.f32 %v2064_v44 }
0x10ac   : > { %3816 = vpow2.f32 %v2571_v46  ;;  %v2761_v46 = vrot.slane %v4399_v43, %v1519_v21  ;;  %v3218_v21 = vld [vmem:[%s4659_s8 + $0x48] sm:$0xff] }
0x10b5   : > { %v3815_v47 = vpop.eup %3814 }
0x10b6   : > { %v2067_v48 = vmul.f32 %v3815_v47, %v3809_v30  ;;  %v3817_v49 = vpop.eup %3816 }
0x10b7   : > { %v2573_v51 = vsel %vm809_vm7, %v3817_v49, 0.0 }
0x10b8   : > { %3526 = vmatmul.mubr.msk.f32.vlgmr.msra.gmra.mrb[26].mxu1 %vm822_vm8, %v2067_v48 }
0x10b9   : > { %3535 = vmatprep.mubr.msk.f32.mxu1 %vm3897_vm3, %v3898_v10 }
0x10c4   : > { %2574 = vadd.xlane.f32.xlu1 %v2573_v51 }
0x10d5   : > { %2579 = vrot.lane.b32.xlu1 %v4429_v58, %s3900_s30  ;;  %s4669_s30 = smov 16  }
0x111c   : > { %v2231_v54 = vpop.xlane.xlu1 %2230 }
0x111d   : > { %3818 = vrcp.f32 %v2231_v54 }
0x1120   : > { %v2403_v55 = vpop.xlane.xlu0 %2402  ;;  %v2408_v57 = vpop.permute.xlu1 %2407 }
0x1121   : > { %3820 = vrcp.f32 %v2403_v55  ;;  %v3217_v55 = vld [vmem:[%s4659_s8 + $0x40] sm:$0xff] }
0x1124   : > { %v2236_v53 = vpop.permute.xlu0 %2235 }
0x1125   : > { %3534 = vmatpush3.msk.msra.mxu1 %vm826_vm6, %v2236_v53  ;;  %v3715_v53 = vpack.c.bf16 %v3218_v21, %v3217_v55  ;;  %v2991_v21 = vrot.slane %v4114_v50, 2 }
0x1126   : > { %3543 = vmatprep.subr.mxu1 %v3898_v10 }
0x1127   : > { %v3819_v16 = vpop.eup %3818 }
0x1128   : > { %v2234_v56 = vmul.f32 %v3819_v16, %v3811_v38 }
0x112a   : > { %3536 = vmatmul.mubr.msk.f32.vlgmr.msra.gmra.mrb[28].mxu1 %vm822_vm8, %v2234_v56  ;;  %v3221_v56 = vld [vmem:[%s4659_s8 + $0x60] sm:$0xff] }
0x112b   : > { %v3821_v59 = vpop.eup %3820  ;;  %3544 = vmatpush3.msk.msra.mxu1 %vm826_vm6, %v2408_v57  ;;  %3545 = vmatprep.mubr.msk.f32.mxu1 %vm3897_vm3, %v3898_v10  ;;  %v3222_v57 = vld [vmem:[%s4659_s8 + $0x68] sm:$0xff] }
0x112c   : > { %v2406_v58 = vmul.f32 %v3821_v59, %v3813_v40  ;;  %3553 = vmatprep.subr.mxu1 %v3898_v10  ;;  %v3213_v40 = vld [vmem:[%s4658_s7 + $0x38] sm:$0xff]  ;;  %v3721_v59 = vpack.c.bf16 %v3222_v57, %v3221_v56 }
0x112d   : > { %v3712_v41 = vpack.c.bf16 %v3213_v40, %v3212_v39 }
0x112e   : > { %3546 = vmatmul.mubr.msk.f32.vlgmr.msra.gmra.mrb[30].mxu1 %vm822_vm8, %v2406_v58  ;;  %v3223_v58 = vld [vmem:[%s4659_s8 + $0x70] sm:$0xff] }
0x112f   : > { %3555 = vmatprep.mubr.msk.f32.mxu1 %vm3897_vm3, %v3898_v10 }
0x1151   : > { %v2575_v62 = vpop.xlane.xlu1 %2574 }
0x1152   : > { %3822 = vrcp.f32 %v2575_v62  ;;  %v3224_v62 = vld [vmem:[%s4659_s8 + $0x78] sm:$0xff] }
0x1155   : > { %v2580_v63 = vpop.permute.xlu1 %2579 }
0x1156   : > { %3554 = vmatpush3.msk.msra.mxu1 %vm826_vm6, %v2580_v63  ;;  %v3724_v63 = vpack.c.bf16 %v3224_v62, %v3223_v58 }
0x1157   : > { %3708 = vmatprep.subr.bf16.mxu1 %v3896_v7 }
0x115c   : > { %v3823_v0 = vpop.eup %3822 }
0x115d   : > { %v2578_v1 = vmul.f32 %v3823_v0, %v3817_v49  ;;  %v2766_v49 = vrot.slane %v4399_v43, %v1524_v22  ;;  %v3219_v22 = vld [vmem:[%s4659_s8 + $0x50] sm:$0xff]  ;;  %v3215_v0 = vld [vmem:[%s4655_s4 + $0x1] ss:$0 sm:$0xff] }
0x115f   : > { %3556 = vmatmul.mubr.msk.f32.vlgmr.msra.gmra.mrb[32].mxu1 %vm822_vm8, %v2578_v1 }
0x1160   : > { %3577 = vmatprep.mubr.msk.f32.mxu1 %vm3897_vm3, %v3898_v10 }
0x118b   : > { %v2140_v3 = vpop.f32.mrb[26].mxu1 }
0x118c   : > { %2144 = vst.msk [vmem:[#allocation3] sm:$0x1f] %vm900_vm9, %v2140_v3  ;;  %v3527_v4 = vpop.f32.mrb[27].mxu1 }
0x11fd   : > { %v2308_v5 = vpop.f32.mrb[28].mxu1 }
0x11fe   : > { %2313 = vrot.lane.b32.xlu1 %v2308_v5, %s4668_s29  ;;  %v3537_v6 = vpop.f32.mrb[29].mxu1  ;;  %s3227_s29 = sshll.u32 %s3983_s17, 4  ;;  %s3906_s17 = smov [#allocation4]  }
0x11ff   : > { %s4609_s12 = scalar_lea.hbm %s4661_s10, %s3227_s29  ;;  %s3836_s27 = sshll.u32 %s3906_s17, 4  ;;  %s3837_s27 = int_to_ptr.vmem [resolvable:$false] %s3836_s27 }
0x1201   : > { %v2480_v9 = vpop.f32.mrb[30].mxu1 }
0x1202   : > { %2485 = vrot.lane.b32.xlu0 %v2480_v9, %s4669_s30  ;;  %v3547_v11 = vpop.f32.mrb[31].mxu1  ;;  %s351_s30 = scalar_lea.vmem [#allocation4], %s350_s28 }
0x1203   : > { %s3081_s11 = sshll.u32 %s351_s30, 4  ;;  %s4611_s11 = int_to_ptr.vmem [resolvable:$true] %s3081_s11 }
0x1204   : > { %s3832_s26 = scalar_lea.vmem %s4611_s11, 16  ;;  %p3839_p0 = scmp.lt.s32.totalorder %s4611_s11, %s3837_s27 }
0x1205   : > { %p3833_p11 = scmp.ne.s32.totalorder %s4611_s11, %s3832_s26 }
0x1207   : > { %p3834_p12 = pnand %p3833_p11, %p4000_p5 }
0x1209   : > { %p3835_p13 = pneg %p3834_p12 }
0x1232   : > { %v2652_v20 = vpop.f32.mrb[32].mxu1 }
0x1233   : > { %2657 = vrot.lane.b32.xlu1 %v2652_v20, %s4670_s18  ;;  %v3557_v24 = vpop.f32.mrb[33].mxu1  ;;  %s3838_s18 = scalar_lea.vmem %s3837_s27, 32 }
0x1234   : > { %p3840_p1 = scmp.lt.s32.totalorder %s3838_s18, %s3832_s26 }
0x1236   : > { %p3841_p2 = por %p3840_p1, %p3839_p0 }
0x1238   : > { %p3842_p3 = pnand %p3841_p2, %p3835_p13 }
0x1270   : > { %v2314_v25 = vpop.permute.xlu1 %2313 }
0x1271   : > { %2316 = vst.msk [vmem:[#allocation3] sm:$0x1f] %vm1073_vm10, %v2314_v25 }
0x1274   : > { %v2486_v26 = vpop.permute.xlu0 %2485 }
0x1275   : > { %2488 = vst.msk [vmem:[#allocation3] sm:$0x1f] %vm1246_vm11, %v2486_v26 }
0x12a5   : > { %v2658_v27 = vpop.permute.xlu1 %2657 }
0x12a6   : > { %2660 = vst.msk [vmem:[#allocation3] sm:$0x1f] %vm1419_vm12, %v2658_v27 }
0x12ad   : > { %v2661_v28 = vld [vmem:[#allocation3] sm:$0x1f] }
0x12ae   : > { %3567 = vmatmul.mubr.msk.f32.vlgmr.msra.gmra.mrb[18].mxu0 %vm507_vm4, %v2661_v28 }
0x12af   : > { %3596 = vmatprep.mubr.msk.f32.mxu0 %vm3897_vm3, %v3898_v10  ;;  %3716 = vmatpush3.bf16.msra.mxu0 %v3715_v53 }
0x12b0   : > { %3717 = vmatprep.subr.bf16.mxu0 %v3896_v7 }
0x1381   : > { %v2740_v15 = vpop.f32.mrb[18].mxu0 }
0x1382   : > { %v2741_v2 = vadd.f32 %v2740_v15, %v2670_v29  ;;  %v3568_v30 = vpop.f32.mrb[19].mxu0 }
0x1384   : > { %v4520_v31 = vadd.f32 %v2741_v2, %v4362_v23  ;;  %v3211_v23 = vld [vmem:[%s4658_s7 + $0x28] sm:$0xff] }
0x1385   : > { %v3709_v38 = vpack.c.bf16 %v3211_v23, %v3210_v60 }
0x1386   : > { %v2745_v32 = vsel %vm478_vm2, %v4520_v31, 0.0 }
0x1387   : > { %2746 = vadd.xlane.f32.xlu0 %v2745_v32  ;;  %3710 = vmatpush3.bf16.msra.mxu1 %v3709_v38 }
0x1388   : > { %3711 = vmatprep.subr.bf16.mxu1 %v3896_v7 }
0x138b   : > { %3713 = vmatpush3.bf16.msra.mxu1 %v3712_v41 }
0x138c   : > { %3726 = vmatprep.subr.bf16.mxu1 %v3896_v7 }
0x1414   : > { %v2747_v33 = vpop.xlane.xlu0 %2746 }
0x1415   : > { %v2748_v34 = vmul.f32 0.03125, %v2747_v33 }
0x1417   : > { %v2749_v35 = vsub.f32 %v4520_v31, %v2748_v34 }
0x1419   : > { %v2750_v36 = vmul.f32 %v2749_v35, %v2749_v35 }
0x141b   : > { %v2751_v37 = vsel %vm478_vm2, %v2750_v36, 0.0 }
0x141c   : > { %2752 = vadd.xlane.f32.xlu1 %v2751_v37  ;;  %v2967_v37 = vrot.slane %v4399_v43, %v1723_v14  ;;  %v2970_v14 = vld [vmem:[%s4660_s9 + $0x8] sm:$0xff] }
0x141d   : > { %v3727_v43 = vpack.c.bf16 %v2970_v14, %v2969_v52 }
0x14a9   : > { %v2753_v42 = vpop.xlane.xlu1 %2752 }
0x14aa   : > { %v2754_v44 = vmul.f32 0.03125, %v2753_v42 }
0x14ac   : > { %v2755_v45 = vadd.f32 1e-05, %v2754_v44 }
0x14ae   : > { %3824 = vrsqrt.f32 %v2755_v45 }
0x14b8   : > { %v3825_v47 = vpop.eup %3824 }
0x14b9   : > { %v2757_v48 = vmul.f32 %v3825_v47, %v2749_v35 }
0x14bb   : > { %v2762_v51 = vmul.f32 %v2761_v46, %v2757_v48  ;;  %v2972_v46 = vld [vmem:[%s4660_s9 + $0x18] sm:$0xff] }
0x14bd   : > { %v2767_v54 = vadd.f32 %v2766_v49, %v2762_v51 }
0x14bf   : > { %3578 = vmatmul.mubr.msk.f32.vlgmr.msra.gmra.mrb[34].mxu1 %vm507_vm4, %v2767_v54  ;;  %v2988_v54 = vrot.slane %v4114_v50, 1 }
0x14c0   : > { %3607 = vmatprep.mubr.msk.f32.mxu1 %vm3897_vm3, %v3898_v10  ;;  %v3220_v10 = vld [vmem:[%s4659_s8 + $0x58] sm:$0xff]  ;;  %3728 = vmatpush3.bf16.msra.mxu1 %v3727_v43 }
0x14c1   : > { %v3718_v16 = vpack.c.bf16 %v3220_v10, %v3219_v22  ;;  %3729 = vmatprep.subr.bf16.mxu1 %v3896_v7  ;;  %v2973_v10 = vld [vmem:[%s4660_s9 + $0x20] sm:$0xff] }
0x14c3   : > { %3719 = vmatpush3.bf16.msra.mxu0 %v3718_v16 }
0x14c4   : > { %3720 = vmatprep.subr.bf16.mxu0 %v3896_v7 }
0x14c7   : > { %3722 = vmatpush3.bf16.msra.mxu0 %v3721_v59 }
0x14c8   : > { %3723 = vmatprep.subr.bf16.mxu0 %v3896_v7 }
0x14cb   : > { %3725 = vmatpush3.bf16.msra.mxu0 %v3724_v63 }
0x1592   : > { %v2850_v1 = vpop.f32.mrb[34].mxu1 }
0x1593   : > { %v2851_v3 = vadd.f32 %v3215_v0, %v2850_v1  ;;  %v3579_v4 = vpop.f32.mrb[35].mxu1 }
0x1595   : > { %v2855_v5 = vmul.f32 0.70710677, %v2851_v3  ;;  %v2854_v34 = vmul.f32 0.5, %v2851_v3 }
0x1597   : > { %v2858_v6 = vand.u32 2147483647, %v2855_v5  ;;  %vm2856_vm15 = vcmp.ge.f32.partialorder %v2855_v5, 0.0 }
0x1598   : > { %v2857_v32 = vsel %vm2856_vm15, 1.0, %v3905_v8 }
0x1599   : > { %v2859_v9 = vmul.f32 0.3275911, %v2858_v6  ;;  %v2872_v61 = vsub.f32 0.0, %v2858_v6 }
0x159b   : > { %v2860_v11 = vadd.f32 1.0, %v2859_v9  ;;  %v2873_v13 = vmul.f32 %v2872_v61, %v2858_v6 }
0x159d   : > { %3826 = vrcp.f32 %v2860_v11  ;;  %v2874_v19 = vmul.f32 1.442695, %v2873_v13 }
0x159f   : > { %3828 = vpow2.f32 %v2874_v19 }
0x15a7   : > { %v3827_v12 = vpop.eup %3826 }
0x15a8   : > { %v2863_v17 = vmul.f32 1.0614054, %v3827_v12 }
0x15a9   : > { %v3829_v15 = vpop.eup %3828 }
0x15aa   : > { %v2864_v18 = vadd.f32 -1.4531521, %v2863_v17 }
0x15ac   : > { %v2865_v20 = vmul.f32 %v3827_v12, %v2864_v18 }
0x15ae   : > { %v2866_v24 = vadd.f32 1.4214138, %v2865_v20 }
0x15b0   : > { %v2867_v25 = vmul.f32 %v3827_v12, %v2866_v24 }
0x15b2   : > { %v2868_v26 = vadd.f32 -0.28449672, %v2867_v25 }
0x15b4   : > { %v2869_v27 = vmul.f32 %v3827_v12, %v2868_v26 }
0x15b6   : > { %v2870_v28 = vadd.f32 0.2548296, %v2869_v27 }
0x15b8   : > { %v2871_v29 = vmul.f32 %v3827_v12, %v2870_v28 }
0x15ba   : > { %v2876_v2 = vmul.f32 %v3829_v15, %v2871_v29 }
0x15bc   : > { %v2877_v30 = vsub.f32 1.0, %v2876_v2 }
0x15be   : > { %v2878_v33 = vmul.f32 %v2877_v30, %v2857_v32 }
0x15c0   : > { %v2879_v35 = vadd.f32 1.0, %v2878_v33 }
0x15c2   : > { %v2880_v36 = vmul.f32 %v2879_v35, %v2854_v34 }
0x15c4   : > { %3597 = vmatmul.mubr.msk.f32.vlgmr.msra.gmra.mrb[20].mxu0 %vm1646_vm14, %v2880_v36 }
0x1697   : > { %v2959_v60 = vpop.f32.mrb[20].mxu0 }
0x1698   : > { %v2963_v23 = vadd.f32 %v2959_v60, %v4520_v31  ;;  %v3598_v38 = vpop.f32.mrb[21].mxu0  ;;  %v2971_v31 = vld [vmem:[%s4660_s9 + $0x10] sm:$0xff] }
0x1699   : > { %v3730_v47 = vpack.c.bf16 %v2972_v46, %v2971_v31 }
0x169a   : > { %v2968_v39 = vadd.f32 %v2967_v37, %v2963_v23 }
0x169b   : > { %3731 = vmatpush3.bf16.msra.mxu1 %v3730_v47 }
0x169c   : > { %v2975_v40 = vsel %vm2974_vm0, %v2968_v39, 0.0 }
0x169d   : > { %2976 = vadd.xlane.f32.xlu0 %v2975_v40 }
0x172a   : > { %v2977_v41 = vpop.xlane.xlu0 %2976 }
0x172b   : > { %v2978_v8 = vmul.f32 0.03125, %v2977_v41 }
0x172d   : > { %v2979_v42 = vsub.f32 %v2968_v39, %v2978_v8 }
0x172f   : > { %v2980_v44 = vmul.f32 %v2979_v42, %v2979_v42 }
0x1731   : > { %v2981_v45 = vsel %vm2974_vm0, %v2980_v44, 0.0 }
0x1732   : > { %2982 = vadd.xlane.f32.xlu0 %v2981_v45 }
0x17bf   : > { %v2983_v48 = vpop.xlane.xlu0 %2982 }
0x17c0   : > { %v2984_v49 = vmul.f32 0.03125, %v2983_v48 }
0x17c2   : > { %v2985_v51 = vadd.f32 1e-05, %v2984_v49 }
0x17c4   : > { %3830 = vrsqrt.f32 %v2985_v51 }
0x17ce   : > { %v3831_v55 = vpop.eup %3830 }
0x17cf   : > { %v2987_v7 = vmul.f32 %v3831_v55, %v2979_v42 }
0x17d1   : > { %v2990_v53 = vmul.f32 %v2988_v54, %v2987_v7 }
0x17d3   : > { %v2993_v22 = vadd.f32 %v2991_v21, %v2990_v53 }
0x17d5   : > { %3608 = vmatmul.mubr.msk.f32.vlgmr.msra.gmra.mrb[36].mxu1 %vm507_vm4, %v2993_v22 }
0x18a8   : > { %v3063_v16 = vpop.f32.mrb[36].mxu1 }
0x18a9   : > { %v3064_v56 = vadd.f32 %v3063_v16, %v2973_v10  ;;  %v3609_v57 = vpop.f32.mrb[37].mxu1 }
0x18ab   : > { %3067 = vst [vmem:[%s351_s30] sm:$0x1] %v3064_v56 }
0x18ac   : > { %3845 = shalt.err (!%p3842_p3)
}
0x18ad   : > { %s3846_s28 = scalar_lea.hbm %s4609_s12, 16  ;;  %s3850_s30 = scalar_lea.hbm %s4661_s10, 32 }
0x18ae   : > { %p3847_p4 = scmp.ne.s32.totalorder %s4609_s12, %s3846_s28  ;;  %p3851_p9 = scmp.lt.u32.totalorder %s4609_s12, %s4661_s10 }
0x18af   : > { %p3852_p10 = scmp.lt.u32.totalorder %s3850_s30, %s3846_s28  ;;  %p3854_p12 = scmp.lt.u32.totalorder %s3846_s28, %s4609_s12 }
0x18b0   : > { %p3848_p7 = pnand %p3847_p4, %p4000_p5 }
0x18b1   : > { %p3853_p11 = por %p3852_p10, %p3851_p9 }
0x18b2   : > { %p3849_p8 = pneg %p3848_p7 }
0x18b3   : > { %p3855_p13 = por %p3854_p12, %p3853_p11 }
0x18b5   : > { %p3856_p0 = pnand %p3855_p13, %p3849_p8 }
0x18b7   : > { %3859 = shalt.err (!%p3856_p0)
}
0x18b8   : > { %3732 = dma.vmem_to_hbm [thread:$0]  (%p4000_p5), %s4611_s11, 16, %s4609_s12, %s3069_s25  }
0x18b9 PF: > { %p3738_p1 = scmp.ge.s32.totalorder %s3894_s16, 2  ;;  %s3093_s26 = sand.u32 1, %s3882_s13  }
0x18ba   : > { %s3094_s17 = scalar_lea.sflag [#allocation5], %s3093_s26 }
0x18bb   : > { %p3735_p2 = pnand %p3738_p1, %p4004_p6 }
0x18bd   : > { %3877 = dma.done.wait (!%p3735_p2), %s3094_s17, 16  }
0x18be   : > { %3879 = vsyncadd (!%p3735_p2), %s3094_s17, 4294967280  ;;  %s4671_s27 = sld [smem:[#allocation7_spill]]  ;;  %p20_p3 = scmp.ge.s32.totalorder %s3987_s19, 4  }
0x18bf   : > { %s4672_s13 = smov %s3886_s14  ;;  %s4673_s14 = smov %s3890_s15 }
0x18c0   : > { %s4675_s16 = smov %s3987_s19  ;;  %22 = sbr.rel (!%p20_p3) target bundleno = 3 (0x3), region = 105 }
0x18c4   : > { %s4674_s15 = smov %s4671_s27 }
0x18c7   :  { %3098 = vsyncpa [#allocation5], 1 }
0x18c8   :  { %3100 = vsyncpa [#allocation5 + $0x1], 1 }

</bundles_post_ra>
